<compile_context>
chip_gen: v7x
topology: tpu7x:2x2x1
jax: 0.10.0
libtpu: 0.0.40
codegen_flags: <defaults>
</compile_context>

<pallas_src>
import jax
import jax.numpy as jnp
from jax.experimental import pallas as pl
from jax.experimental.pallas import tpu as pltpu


def _disc_layer_kernel(x_ref, w_ref, b_ref, s_ref, o_ref, acc_ref):
    """Computes one (tm, tn) output tile; reduction over the D_in grid axis (axis 2)."""
    k = pl.program_id(2)

    @pl.when(k == 0)
    def _init():
        acc_ref[...] = jnp.zeros_like(acc_ref)

    # Linear: x tile (tm, tk) contracted against native-layout weight tile (tn, tk)
    # on their last dims -> (tm, tn), accumulated in f32 on the MXU.
    acc_ref[...] += jax.lax.dot_general(
        x_ref[...],
        w_ref[...],
        dimension_numbers=(((1,), (1,)), ((), ())),
        preferred_element_type=jnp.float32,
    )

    @pl.when(k == pl.num_programs(2) - 1)
    def _finalize():
        z = acc_ref[...] + b_ref[...]                # bias (1, tn) broadcasts over (tm, tn)
        act = jnp.where(z >= 0, z, 0.2 * z)          # LeakyReLU(negative_slope=0.2)
        # Dropout(p=0.5), training semantics: s_ref holds 0.0 (dropped) or 2.0 (kept * 1/(1-p)).
        o_ref[...] = (act * s_ref[...]).astype(o_ref.dtype)


def _pick_tile(dim, prefs):
    """Largest preferred tile that evenly divides `dim`, else the full dimension."""
    for p in prefs:
        if dim % p == 0:
            return p
    return dim


def standard_discriminator_layer(x, w, b, dropout_scale):
    """x: (B, D_in); w: (D_out, D_in) PyTorch Linear layout; b: (D_out,);
    dropout_scale: (B, D_out) with values in {0.0, 2.0} (training-mode Dropout(0.5) mask)."""
    B, D_in = x.shape
    D_out = w.shape[0]
    assert w.shape == (D_out, D_in)
    assert b.shape == (D_out,)
    assert dropout_scale.shape == (B, D_out)

    b2 = b.reshape(1, D_out)

    tm = _pick_tile(B, (256, 128, 8))
    tn = _pick_tile(D_out, (256, 128))      # keep output lane-dense when D_out allows
    tk = _pick_tile(D_in, (256, 128))
    grid = (B // tm, D_out // tn, D_in // tk)

    return pl.pallas_call(
        _disc_layer_kernel,
        out_shape=jax.ShapeDtypeStruct((B, D_out), x.dtype),
        grid_spec=pltpu.PrefetchScalarGridSpec(
            num_scalar_prefetch=0,
            grid=grid,
            in_specs=[
                pl.BlockSpec((tm, tk), lambda i, j, k: (i, k)),   # x tile
                pl.BlockSpec((tn, tk), lambda i, j, k: (j, k)),   # weight tile, native layout
                pl.BlockSpec((1, tn), lambda i, j, k: (0, j)),    # bias: independent of i and k
                pl.BlockSpec((tm, tn), lambda i, j, k: (i, j)),   # dropout keep-scale
            ],
            out_specs=pl.BlockSpec((tm, tn), lambda i, j, k: (i, j)),
            scratch_shapes=[pltpu.VMEM((tm, tn), jnp.float32)],   # f32 accumulator
        ),
        compiler_params=pltpu.CompilerParams(
            dimension_semantics=("parallel", "parallel", "arbitrary"),
        ),
    )(x, w, b2, dropout_scale)


if __name__ == "__main__":
    # Linear(input_dim=512, output_dim=512), batch=512 -> MXU/lane-aligned 256 tiles, grid (2, 2, 2),
    # exercising the accumulator init/finalize path and the lane-dense output stores.
    B, D_IN, D_OUT = 512, 512, 512

    key = jax.random.PRNGKey(0)
    kx, kw, kb, kd = jax.random.split(key, 4)

    x = jax.random.normal(kx, (B, D_IN), dtype=jnp.float32)
    # PyTorch Linear init-style params (weight (D_out, D_in), bias (D_out,)).
    bound = 1.0 / (D_IN ** 0.5)
    w = jax.random.uniform(kw, (D_OUT, D_IN), minval=-bound, maxval=bound, dtype=jnp.float32)
    b = jax.random.uniform(kb, (D_OUT,), minval=-bound, maxval=bound, dtype=jnp.float32)

    # Training-mode Dropout(0.5): keep each element w.p. 0.5, scale survivors by 1/(1-p) = 2.
    keep = jax.random.bernoulli(kd, 0.5, (B, D_OUT))
    dropout_scale = keep.astype(jnp.float32) * 2.0

    out = standard_discriminator_layer(x, w, b, dropout_scale)
    out = jax.block_until_ready(out)

    assert out.shape == (B, D_OUT)
    assert out.dtype == jnp.float32

    # Reference: Linear -> LeakyReLU(0.2) -> Dropout with the identical mask.
    z = jax.lax.dot_general(
        x, w, (((1,), (1,)), ((), ())),
        preferred_element_type=jnp.float32,
        precision=jax.lax.Precision.HIGHEST,
    ) + b
    ref = jnp.where(z >= 0, z, 0.2 * z) * dropout_scale
    assert bool(jnp.allclose(out, ref, atol=5e-3, rtol=5e-3))

    print("KERNEL_OK")
</pallas_src>

<mosaic_0001>
module attributes {stable_mosaic.version = 11 : i64} {
  func.func @_disc_layer_kernel(%arg0: i32, %arg1: i32, %arg2: i32, %arg3: memref<256x256xf32, #tpu.memory_space<vmem>>, %arg4: memref<256x256xf32, #tpu.memory_space<vmem>>, %arg5: memref<1x256xf32, #tpu.memory_space<vmem>>, %arg6: memref<256x256xf32, #tpu.memory_space<vmem>>, %arg7: memref<256x256xf32, #tpu.memory_space<vmem>>, %arg8: memref<256x256xf32, #tpu.memory_space<vmem>>) attributes {dimension_semantics = [#tpu.dimension_semantics<parallel>, #tpu.dimension_semantics<parallel>, #tpu.dimension_semantics<arbitrary>], iteration_bounds = array<i64: 2, 2, 2>, scalar_prefetch = 0 : i64, scratch_operands = 1 : i64, tpu.core_type = #tpu.core_type<tc>, window_params = [{transform_indices = @transform_0, window_bounds = array<i64: 256, 256>}, {transform_indices = @transform_1, window_bounds = array<i64: 256, 256>}, {transform_indices = @transform_2, window_bounds = array<i64: 1, 256>}, {transform_indices = @transform_3, window_bounds = array<i64: 256, 256>}, {transform_indices = @transform_4, window_bounds = array<i64: 256, 256>}]} {
    %c0_i32 = arith.constant 0 : i32
    %0 = arith.cmpi eq, %arg2, %c0_i32 : i32
    %1 = arith.extui %0 : i1 to i32
    %c0_i32_0 = arith.constant 0 : i32
    %2 = arith.cmpi ne, %1, %c0_i32_0 : i32
    scf.if %2 {
      %cst_9 = arith.constant 0.000000e+00 : f32
      %12 = vector.broadcast %cst_9 : f32 to vector<256x256xf32>
      %c0_10 = arith.constant 0 : index
      %c0_11 = arith.constant 0 : index
      %13 = vector.load %arg8[%c0_10, %c0_11] : memref<256x256xf32, #tpu.memory_space<vmem>>, vector<256x256xf32>
      tpu.vector_store %arg8[%c0_10, %c0_11], %12 {strides = array<i32>} : memref<256x256xf32, #tpu.memory_space<vmem>>, vector<256x256xf32>,
    } else {
    }
    %c0 = arith.constant 0 : index
    %c0_1 = arith.constant 0 : index
    %3 = vector.load %arg8[%c0, %c0_1] : memref<256x256xf32, #tpu.memory_space<vmem>>, vector<256x256xf32>
    %c0_2 = arith.constant 0 : index
    %c0_3 = arith.constant 0 : index
    %4 = vector.load %arg3[%c0_2, %c0_3] : memref<256x256xf32, #tpu.memory_space<vmem>>, vector<256x256xf32>
    %c0_4 = arith.constant 0 : index
    %c0_5 = arith.constant 0 : index
    %5 = vector.load %arg4[%c0_4, %c0_5] : memref<256x256xf32, #tpu.memory_space<vmem>>, vector<256x256xf32>
    %cst = arith.constant dense<0.000000e+00> : vector<256x256xf32>
    %6 = tpu.matmul %4, %5, %cst {dimension_numbers = #tpu.dot_dimension_numbers<[1], [1], [0], [0], [0, 0, 1, 0], [], []>} : vector<256x256xf32>, vector<256x256xf32>, vector<256x256xf32> -> vector<256x256xf32>
    %7 = arith.addf %3, %6 : vector<256x256xf32>
    %c0_6 = arith.constant 0 : index
    %c0_7 = arith.constant 0 : index
    %8 = vector.load %arg8[%c0_6, %c0_7] : memref<256x256xf32, #tpu.memory_space<vmem>>, vector<256x256xf32>
    tpu.vector_store %arg8[%c0_6, %c0_7], %7 {strides = array<i32>} : memref<256x256xf32, #tpu.memory_space<vmem>>, vector<256x256xf32>,
    %c1_i32 = arith.constant 1 : i32
    %9 = arith.cmpi eq, %arg2, %c1_i32 : i32
    %10 = arith.extui %9 : i1 to i32
    %c0_i32_8 = arith.constant 0 : i32
    %11 = arith.cmpi ne, %10, %c0_i32_8 : i32
    scf.if %11 {
      %c0_9 = arith.constant 0 : index
      %c0_10 = arith.constant 0 : index
      %12 = vector.load %arg8[%c0_9, %c0_10] : memref<256x256xf32, #tpu.memory_space<vmem>>, vector<256x256xf32>
      %c0_11 = arith.constant 0 : index
      %c0_12 = arith.constant 0 : index
      %13 = vector.load %arg5[%c0_11, %c0_12] : memref<1x256xf32, #tpu.memory_space<vmem>>, vector<1x256xf32>
      %14 = vector.broadcast %13 : vector<1x256xf32> to vector<256x256xf32>
      %15 = arith.addf %12, %14 : vector<256x256xf32>
      %cst_13 = arith.constant 0.000000e+00 : f32
      %16 = vector.broadcast %cst_13 : f32 to vector<256x256xf32>
      %17 = arith.cmpf oge, %15, %16 : vector<256x256xf32>
      %cst_14 = arith.constant 2.000000e-01 : f32
      %18 = vector.broadcast %cst_14 : f32 to vector<256x256xf32>
      %19 = arith.mulf %18, %15 : vector<256x256xf32>
      %20 = arith.select %17, %15, %19 : vector<256x256xi1>, vector<256x256xf32>
      %c0_15 = arith.constant 0 : index
      %c0_16 = arith.constant 0 : index
      %21 = vector.load %arg6[%c0_15, %c0_16] : memref<256x256xf32, #tpu.memory_space<vmem>>, vector<256x256xf32>
      %22 = arith.mulf %20, %21 : vector<256x256xf32>
      %c0_17 = arith.constant 0 : index
      %c0_18 = arith.constant 0 : index
      %23 = vector.load %arg7[%c0_17, %c0_18] : memref<256x256xf32, #tpu.memory_space<vmem>>, vector<256x256xf32>
      tpu.vector_store %arg7[%c0_17, %c0_18], %22 {strides = array<i32>} : memref<256x256xf32, #tpu.memory_space<vmem>>, vector<256x256xf32>,
    } else {
    }
    return
  }
  func.func @transform_0(%arg0: i32, %arg1: i32, %arg2: i32) -> (i32, i32) {
    %c0_i32 = arith.constant 0 : i32
    return %arg0, %arg2 : i32, i32
  }
  func.func @transform_1(%arg0: i32, %arg1: i32, %arg2: i32) -> (i32, i32) {
    %c0_i32 = arith.constant 0 : i32
    return %arg1, %arg2 : i32, i32
  }
  func.func @transform_2(%arg0: i32, %arg1: i32, %arg2: i32) -> (i32, i32) {
    %c0_i32 = arith.constant 0 : i32
    %c0_i32_0 = arith.constant 0 : i32
    return %c0_i32, %arg1 : i32, i32
  }
  func.func @transform_3(%arg0: i32, %arg1: i32, %arg2: i32) -> (i32, i32) {
    %c0_i32 = arith.constant 0 : i32
    return %arg0, %arg1 : i32, i32
  }
  func.func @transform_4(%arg0: i32, %arg1: i32, %arg2: i32) -> (i32, i32) {
    %c0_i32 = arith.constant 0 : i32
    return %arg0, %arg1 : i32, i32
  }
}

</mosaic_0001>

<bundles_post_ra>
// kernel: tpu_custom_call.1
= control target key start
LH: loop header
LB: loop body
LE: loop exit
PB: predicated region body
PF: predicated region fallthrough
CT: control target
= control target key end

     0   :  { %s3175_s0 = inlined_call_operand.hbm [shape: f32[512,512], index: 0, kind: input, shape index: {}]   ;;  %s3176_s1 = inlined_call_operand.hbm [shape: f32[512,512], index: 1, kind: input, shape index: {}]   ;;  %s3177_s2 = inlined_call_operand.vmem [shape: f32[1,512], index: 2, kind: input, shape index: {}]   ;;  %s3178_s3 = inlined_call_operand.hbm [shape: f32[512,512], index: 3, kind: input, shape index: {}]   ;;  %s3179_s4 = inlined_call_operand.hbm [shape: f32[512,512], index: 4, kind: output, shape index: {}]  }
   0x1   :  { %3206 = sst [smem:[#allocation27_spill]] %s3175_s0 }
   0x2   :  { %3207 = sst [smem:[#allocation28_spill]] %s3176_s1 }
   0x3   :  { %3208 = sst [smem:[#allocation29_spill]] %s3177_s2 }
   0x4   :  { %3209 = sst [smem:[#allocation30_spill]] %s3178_s3 }
   0x5   :  { %3210 = sst [smem:[#allocation31_spill]] %s3179_s4 }
   0x6   :  { %9 = vsyncpa [#allocation4], 0 }
   0x7   :  { %11 = vsyncpa [#allocation4 + $0x1], 0 }
   0x8   :  { %12 = vsyncpa [#allocation7], 0 }
   0x9   :  { %14 = vsyncpa [#allocation7 + $0x1], 0 }
   0xa   :  { %15 = vsyncpa [#allocation5], 0 }
   0xb   :  { %17 = vsyncpa [#allocation5 + $0x1], 0  ;;  %s2291_s15 = smov 0   ;;  %s2293_s16 = smov 0  }
   0xc   :  { %s2295_s17 = smov 0   ;;  %s2297_s18 = smov 0  }
   0xd   :  { %s2299_s19 = smov 0   ;;  %s2301_s20 = smov 0  }
   0xe   :  { %s2303_s21 = smov 0   ;;  %s2305_s22 = smov 0  }
   0xf   :  { %s2307_s23 = smov 0   ;;  %s2309_s24 = smov 0  }
  0x10   :  { %s2311_s25 = smov 0   ;;  %s2313_s26 = smov 0  }
  0x11   :  { %s2315_s27 = smov 0   ;;  %s2317_s28 = smov 0  }
  0x12   :  { %s2319_s29 = smov 0   ;;  %s2321_s30 = smov 0  }
  0x13 LB: > { %3211 = sst [smem:[#allocation14_spill]] %s2193_s15  ;;  %s2370_s5 = sadd.s32 4294967295, %s2253_s30   ;;  %s2253_s30 = sphi %s2321_s30, %s23_s30   ;;  %s2249_s29 = sphi %s2319_s29, %s3292_s29   ;;  %s2245_s28 = sphi %s2317_s28, %s3278_s28   ;;  %s2241_s27 = sphi %s2315_s27, %s3291_s27   ;;  %s2237_s26 = sphi %s2313_s26, %s3276_s26   ;;  %s2233_s25 = sphi %s2311_s25, %s3290_s25   ;;  %s2229_s24 = sphi %s2309_s24, %s3289_s24   ;;  %s2225_s23 = sphi %s2307_s23, %s3288_s23   ;;  %s2221_s22 = sphi %s2305_s22, %s3287_s22   ;;  %s2217_s21 = sphi %s2303_s21, %s3286_s21   ;;  %s2213_s20 = sphi %s2301_s20, %s3285_s20   ;;  %s2209_s19 = sphi %s2299_s19, %s3284_s19   ;;  %s2205_s18 = sphi %s2297_s18, %s3283_s18   ;;  %s2201_s17 = sphi %s2295_s17, %s3282_s17   ;;  %s2197_s16 = sphi %s2293_s16, %s3281_s16   ;;  %s2193_s15 = sphi %s2291_s15, %s3272_s15  }
  0x14   : > { %3212 = sst [smem:[#allocation15_spill]] %s2197_s16  ;;  %s35_s6 = sadd.s32 1, %s2241_s27 }
  0x15   : > { %3213 = sst [smem:[#allocation16_spill]] %s2209_s19  ;;  %p36_p0 = scmp.ge.s32.totalorder %s35_s6, 2 }
  0x16   : > { %3214 = sst [smem:[#allocation17_spill]] %s2229_s24  ;;  %s38_s7 = sadd.s32 1, %s2245_s28 }
  0x17   : > { %3215 = sst [smem:[#allocation18_spill]] %s2233_s25  ;;  %p3190_p1 = scmp.eq.s32.totalorder %s2253_s30, 0 }
  0x18   : > { %3216 = sst [smem:[#allocation19_spill]] %s2237_s26  ;;  %p3191_p2 = scmp.eq.s32.totalorder %s2370_s5, 0 }
  0x19   : > { %3217 = sst [smem:[#allocation20_spill]] %s2245_s28  ;;  %s3294_s6 = smov (%p36_p0, %s35_s6), 0 }
  0x1a   : > { %3218 = sst [smem:[#allocation21_spill]] %s2249_s29  ;;  %s3296_s7 = smov (!%p36_p0, %s38_s7), %s2245_s28 }
  0x1b   : > { %3219 = sst [smem:[#allocation22_spill]] %s3294_s6  ;;  %s2383_s8 = ssub.s32 %s2241_s27, %s3294_s6 }
  0x1c   : > { %s79_s9 = sadd.s32 1, %s2213_s20  ;;  %p3192_p3 = scmp.ge.s32.totalorder %s3296_s7, 2 }
  0x1d   : > { %p86_p4 = scmp.ne.s32.totalorder %s2213_s20, %s2209_s19  ;;  %p92_p5 = scmp.ne.s32.totalorder %s2209_s19, %s2205_s18 }
  0x1e   : > { %s2393_s10 = scalar_select %p3192_p3, 0, %s3296_s7  }
  0x1f   : > { %p2397_p6 = por %p86_p4, %p3190_p1  ;;  %p2403_p7 = por %p92_p5, %p3191_p2 }
  0x20   : > { %3220 = sst [smem:[#allocation23_spill]] %s2393_s10  ;;  %s2409_s13 = ssub.s32 %s2245_s28, %s2393_s10 }
  0x21   : > { %s3222_s12 = scalar_select %p2403_p7, 1, 0 }
  0x22   : > { %p3189_p8 = scmp.lt.s32.totalorder %s2253_s30, 8  ;;  %s76_s14 = sor.u32 %s2409_s13, %s2383_s8 }
  0x23   : > { %3223 = sst [smem:[#allocation24_spill]] %s3222_s12  ;;  %s1706_s18 = sshll.u32 %s2241_s27, 1 }
  0x24   : > { %p77_p9 = scmp.eq.s32.totalorder %s76_s14, 0  ;;  %s222_s4 = sand.u32 1, %s2253_s30  }
  0x25   : > { %s224_s26 = sand.u32 1, %s2213_s20   ;;  %s1735_s2 = sshll.u32 %s2245_s28, 7 }
  0x26   : > { %s2416_s6 = scalar_select %p77_p9, %s2213_s20, %s79_s9  }
  0x27   : > { %s1709_s24 = sshll.u32 %s224_s26, 9  ;;  %s233_s25 = sadd.s32 %s1735_s2, %s1706_s18 }
  0x28   : > { %3224 = sst [smem:[#allocation25_spill]] %s2416_s6  ;;  %s226_s12 = scalar_lea.vmem [#allocation6], %s1709_s24 }
  0x29   : > { %s236_s10 = sshll.u32 %s226_s12, 4  ;;  %s1713_s19 = sshll.u32 %s233_s25, 7  ;;  %s2423_s10 = int_to_ptr.vmem [resolvable:$true] %s236_s10 }
  0x2a   : > { %s3225_s1 = sld [smem:[#allocation28_spill]]  ;;  %p2434_p10 = pnand %p3189_p8, %p2397_p6 }
  0x2b   : > { %s2440_s2 = scalar_lea.sflag [#allocation7], %s222_s4 }
  0x2c   : > { %p1995_p0 = pneg %p2434_p10 }
  0x30   : > { %s2428_s16 = scalar_lea.hbm %s3225_s1, %s1713_s19  ;;  %s1998_s19 = scalar_lea.hbm %s3225_s1, 32768 }
  0x31   : > { %s1993_s24 = scalar_lea.hbm %s2428_s16, 8192  ;;  %p1999_p6 = scmp.lt.u32.totalorder %s2428_s16, %s3225_s1 }
  0x32   : > { %p1994_p13 = scmp.ne.s32.totalorder %s2428_s16, %s1993_s24  ;;  %p2000_p9 = scmp.lt.u32.totalorder %s1998_s19, %s1993_s24 }
  0x33   : > { %p2002_p1 = scmp.lt.u32.totalorder %s1993_s24, %s2428_s16 }
  0x34   : > { %p1996_p4 = pnand %p1995_p0, %p1994_p13  ;;  %p2001_p8 = por %p2000_p9, %p1999_p6 }
  0x36   : > { %p1997_p5 = pneg %p1996_p4  ;;  %p2003_p2 = por %p2002_p1, %p2001_p8 }
  0x38   : > { %p2004_p3 = pnand %p2003_p2, %p1997_p5 }
  0x3a   : > { %2007 = shalt.err (!%p2004_p3)
}
  0x3b   : > { %s2008_s4 = scalar_lea.vmem %s2423_s10, 8192  ;;  %s2255_s11 = smov [#allocation6]  }
  0x3c   : > { %p2009_p13 = scmp.ne.s32.totalorder %s2423_s10, %s2008_s4  ;;  %s2013_s12 = sshll.u32 %s2255_s11, 4  ;;  %s2014_s12 = int_to_ptr.vmem [resolvable:$false] %s2013_s12 }
  0x3d   : > { %s2015_s14 = scalar_lea.vmem %s2014_s12, 16384  ;;  %p2016_p12 = scmp.lt.s32.totalorder %s2423_s10, %s2014_s12 }
  0x3e   : > { %p2011_p4 = pnand %p2009_p13, %p1995_p0  ;;  %p2017_p6 = scmp.lt.s32.totalorder %s2015_s14, %s2008_s4 }
  0x40   : > { %p2012_p11 = pneg %p2011_p4  ;;  %p2018_p9 = por %p2017_p6, %p2016_p12 }
  0x42   : > { %p2019_p1 = pnand %p2018_p9, %p2012_p11 }
  0x44   : > { %2022 = shalt.err (!%p2019_p1)
}
  0x45   : > { %s3193_s24 = smov 512   ;;  %s3195_s3 = smov 256  }
  0x46   : > { %s3197_s15 = smov 16   ;;  %p3227_p2 = scmp.lt.s32.totalorder %s2253_s30, 9 }
  0x47   : > { %1848 = dma.hbm_to_vmem [thread:$0]  (!%p2434_p10), %s2428_s16, 8192, %s2423_s10, %s2440_s2, %s3193_s24, %s3195_s3, %s3197_s15  }
  0x48   : > { %p3228_p3 = scmp.ge.s32.totalorder %s2253_s30, 1  ;;  %s42_s25 = sadd.s32 1, %s2249_s29 }
  0x49   : > { %p3230_p11 = scmp.ge.s32.totalorder %s3296_s7, 2  ;;  %p58_p12 = scmp.ne.s32.totalorder %s2225_s23, %s2221_s22 }
  0x4a   : > { %p2475_p8 = pnand %p3228_p3, %p3227_p2  ;;  %p64_p0 = scmp.ne.s32.totalorder %s2221_s22, %s2217_s21 }
  0x4b   : > { %s3298_s25 = smov (!%p3230_p11, %s42_s25), %s2249_s29  ;;  %s198_s26 = sand.u32 1, %s2225_s23  }
  0x4c   : > { %p44_p5 = scmp.ge.s32.totalorder %s3298_s25, 2  ;;  %s51_s9 = sadd.s32 1, %s2225_s23 }
  0x4d   : > { %p3231_p13 = scmp.eq.s32.totalorder %s2370_s5, 0  ;;  %p3234_p4 = scmp.eq.s32.totalorder %s2253_s30, 0 }
  0x4e   : > { %s3300_s25 = smov (%p44_p5, %s3298_s25), 0  ;;  %s1704_s21 = sshll.u32 %s198_s26, 9 }
  0x4f   : > { %p2491_p10 = por %p3231_p13, %p64_p0  ;;  %3233 = sst [smem:[#allocation26_spill]] %s3300_s25 }
  0x50   : > { %p2499_p6 = por %p3234_p4, %p58_p12  ;;  %s2505_s10 = ssub.s32 %s2249_s29, %s3300_s25 }
  0x51   : > { %s3232_s16 = scalar_select %p2491_p10, 1, 0 }
  0x52   : > { %s48_s4 = sor.u32 %s2383_s8, %s2505_s10  ;;  %s130_s11 = sor.u32 %s2409_s13, %s2505_s10 }
  0x53   : > { %p49_p9 = scmp.eq.s32.totalorder %s48_s4, 0  ;;  %s1734_s12 = sshll.u32 %s2249_s29, 7 }
  0x54   : > { %s202_s14 = scalar_lea.vmem [#allocation3], %s1704_s21  ;;  %s209_s15 = sadd.s32 %s1734_s12, %s1706_s18 }
  0x55   : > { %s212_s24 = sshll.u32 %s202_s14, 4  ;;  %s1708_s1 = sshll.u32 %s209_s15, 7  ;;  %s2517_s24 = int_to_ptr.vmem [resolvable:$true] %s212_s24 }
  0x56   : > { %s2513_s3 = scalar_select %p49_p9, %s2225_s23, %s51_s9  }
  0x57   : > { %p3236_p1 = scmp.lt.s32.totalorder %s2253_s30, 8  ;;  %s3238_s0 = sld [smem:[#allocation27_spill]] }
  0x58   : > { %s1716_s18 = sshll.u32 %s2245_s28, 1  ;;  %s2535_s15 = scalar_lea.sflag [#allocation4], %s198_s26 }
  0x59   : > { %p2523_p2 = pnand %p3236_p1, %p2499_p6  ;;  %s2533_s9 = sadd.s32 %s1734_s12, %s1716_s18 }
  0x5b   : > { %p2025_p11 = pneg %p2523_p2 }
  0x5d   : > { %s2530_s21 = scalar_lea.hbm %s3238_s0, %s1708_s1  ;;  %s2028_s4 = scalar_lea.hbm %s3238_s0, 32768 }
  0x5e   : > { %s2023_s7 = scalar_lea.hbm %s2530_s21, 8192  ;;  %p2029_p5 = scmp.lt.u32.totalorder %s2530_s21, %s3238_s0 }
  0x5f   : > { %p2024_p3 = scmp.ne.s32.totalorder %s2530_s21, %s2023_s7  ;;  %p2030_p13 = scmp.lt.u32.totalorder %s2028_s4, %s2023_s7 }
  0x60   : > { %p2032_p6 = scmp.lt.u32.totalorder %s2023_s7, %s2530_s21 }
  0x61   : > { %p2026_p12 = pnand %p2025_p11, %p2024_p3  ;;  %p2031_p4 = por %p2030_p13, %p2029_p5 }
  0x63   : > { %p2027_p0 = pneg %p2026_p12  ;;  %p2033_p9 = por %p2032_p6, %p2031_p4 }
  0x65   : > { %p2034_p1 = pnand %p2033_p9, %p2027_p0 }
  0x67   : > { %2037 = shalt.err (!%p2034_p1)
}
  0x68   : > { %s2038_s26 = scalar_lea.vmem %s2517_s24, 8192  ;;  %s2259_s12 = smov [#allocation3]  }
  0x69   : > { %p2039_p3 = scmp.ne.s32.totalorder %s2517_s24, %s2038_s26  ;;  %s2043_s18 = sshll.u32 %s2259_s12, 4  ;;  %s2044_s18 = int_to_ptr.vmem [resolvable:$false] %s2043_s18 }
  0x6a   : > { %s2045_s6 = scalar_lea.vmem %s2044_s18, 16384  ;;  %p2046_p10 = scmp.lt.s32.totalorder %s2517_s24, %s2044_s18 }
  0x6b   : > { %p2041_p12 = pnand %p2039_p3, %p2025_p11  ;;  %p2047_p5 = scmp.lt.s32.totalorder %s2045_s6, %s2038_s26 }
  0x6d   : > { %p2042_p7 = pneg %p2041_p12  ;;  %p2048_p13 = por %p2047_p5, %p2046_p10 }
  0x6f   : > { %p2049_p4 = pnand %p2048_p13, %p2042_p7 }
  0x71   : > { %2052 = shalt.err (!%p2049_p4)
}
  0x72   : > { %s3239_s7 = smov 16   ;;  %s3240_s1 = smov 256  }
  0x73   : > { %s3241_s4 = smov 512   ;;  %s3242_s14 = sld [smem:[#allocation15_spill]] }
  0x74   : > { %s3243_s8 = sld [smem:[#allocation14_spill]]  ;;  %p131_p7 = scmp.eq.s32.totalorder %s130_s11, 0 }
  0x75   : > { %1845 = dma.hbm_to_vmem [thread:$0]  (!%p2523_p2), %s2530_s21, 8192, %s2517_s24, %s2535_s15, %s3241_s4, %s3240_s1, %s3239_s7  }
  0x76   : > { %s1718_s25 = sshll.u32 %s2533_s9, 7  ;;  %s1701_s26 = sadd.s32 4294967294, %s2253_s30  }
  0x77   : > { %s133_s12 = sadd.s32 1, %s2201_s17  ;;  %p172_p0 = scmp.eq.s32.totalorder %s2370_s5, 7 }
  0x78   : > { %s2573_s18 = scalar_select %p131_p7, %s2201_s17, %s133_s12  }
  0x79   : > { %p140_p10 = scmp.ne.s32.totalorder %s2201_s17, %s3242_s14  ;;  %p178_p6 = scmp.eq.s32.totalorder %s1701_s26, 7 }
  0x7a   : > { %p146_p11 = scmp.ne.s32.totalorder %s3242_s14, %s3243_s8  ;;  %p3244_p9 = scmp.eq.s32.totalorder %s2253_s30, 0 }
  0x7b   : > { %p3245_p3 = scmp.eq.s32.totalorder %s2370_s5, 0  ;;  %p2588_p5 = por %p172_p0, %p140_p10 }
  0x7c   : > { %p142_p1 = por %p140_p10, %p3244_p9  ;;  %p2592_p2 = por %p178_p6, %p146_p11 }
  0x7d   : > { %p2584_p12 = por %p146_p11, %p3245_p3  ;;  %s256_s10 = sand.u32 1, %s2201_s17  }
  0x7e   : > { %s3247_s24 = scalar_select %p2588_p5, 1, 0 }
  0x7f   : > { %s3246_s6 = scalar_select %p2584_p12, 1, 0 }
  0x80   : > { %s3248_s13 = scalar_select %p2592_p2, 1, 0 }
  0x81   : > { %p3249_p13 = scmp.lt.s32.totalorder %s2253_s30, 8  ;;  %s3251_s15 = sld [smem:[#allocation30_spill]] }
  0x82   : > { %s1714_s26 = sshll.u32 %s256_s10, 9 }
  0x83   : > { %p2599_p4 = pnand %p3249_p13, %p142_p1  ;;  %s258_s12 = scalar_lea.vmem [#allocation8], %s1714_s26 }
  0x84   : > { %s268_s0 = sshll.u32 %s258_s12, 4  ;;  %s2608_s0 = int_to_ptr.vmem [resolvable:$true] %s268_s0 }
  0x85   : > { %p2055_p10 = pneg %p2599_p4 }
  0x87   : > { %s3252_s14 = smov %s3251_s15  ;;  %s2606_s8 = scalar_lea.hbm %s3251_s15, %s1718_s25 }
  0x88   : > { %s2053_s29 = scalar_lea.hbm %s2606_s8, 8192  ;;  %s2058_s9 = scalar_lea.hbm %s3252_s14, 32768 }
  0x89   : > { %p2054_p7 = scmp.ne.s32.totalorder %s2606_s8, %s2053_s29  ;;  %p2059_p6 = scmp.lt.u32.totalorder %s2606_s8, %s3252_s14 }
  0x8a   : > { %p2060_p9 = scmp.lt.u32.totalorder %s2058_s9, %s2053_s29  ;;  %p2062_p3 = scmp.lt.u32.totalorder %s2053_s29, %s2606_s8 }
  0x8b   : > { %p2056_p11 = pnand %p2055_p10, %p2054_p7 }
  0x8c   : > { %p2061_p1 = por %p2060_p9, %p2059_p6 }
  0x8d   : > { %p2057_p0 = pneg %p2056_p11 }
  0x8e   : > { %p2063_p13 = por %p2062_p3, %p2061_p1 }
  0x90   : > { %p2064_p2 = pnand %p2063_p13, %p2057_p0 }
  0x92   : > { %2067 = shalt.err (!%p2064_p2)
}
  0x93   : > { %s2068_s10 = scalar_lea.vmem %s2608_s0, 8192  ;;  %s2260_s26 = smov [#allocation8]  }
  0x94   : > { %p2069_p7 = scmp.ne.s32.totalorder %s2608_s0, %s2068_s10  ;;  %s2073_s12 = sshll.u32 %s2260_s26, 4  ;;  %s2074_s12 = int_to_ptr.vmem [resolvable:$false] %s2073_s12 }
  0x95   : > { %s2075_s28 = scalar_lea.vmem %s2074_s12, 16384  ;;  %p2076_p12 = scmp.lt.s32.totalorder %s2608_s0, %s2074_s12 }
  0x96   : > { %p2071_p11 = pnand %p2069_p7, %p2055_p10  ;;  %p2077_p6 = scmp.lt.s32.totalorder %s2075_s28, %s2068_s10 }
  0x98   : > { %p2072_p5 = pneg %p2071_p11  ;;  %p2078_p9 = por %p2077_p6, %p2076_p12 }
  0x9a   : > { %p2079_p1 = pnand %p2078_p9, %p2072_p5 }
  0x9c   : > { %2082 = shalt.err (!%p2079_p1)
}
  0x9d   : > { %1851 = dma.hbm_to_vmem [thread:$0]  (!%p2599_p4), %s2606_s8, 8192, %s2608_s0, %s2440_s2, %s3241_s4, %s3240_s1, %s3239_s7  }
  0x9e   : > { %280 = sbr.rel (%p2475_p8) target bundleno = 741 (0x2e5), region = 36  ;;  %s282_s29 = sand.u32 (!%p2475_p8), 1, %s2221_s22  }
  0x9f   : > { %s1720_s21 = sshll.u32 (!%p2475_p8), %s282_s29, 9  ;;  %s283_s25 = scalar_lea.sflag (!%p2475_p8), [#allocation4], %s282_s29 }
  0xa0   : > { %s2642_s9 = scalar_lea.vmem (!%p2475_p8), [#allocation3], %s1720_s21  ;;  %p3253_p12 = scmp.ne.s32.totalorder (!%p2475_p8), %s3232_s16, 0 }
  0xa5   : > { %2176 = dma.done.wait (%p3253_p12), %s283_s25, 8192  }
  0xa6   : > { %2178 = vsyncadd (%p3253_p12), %s283_s25, 4294959104  ;;  %s3254_s11 = sld [smem:[#allocation16_spill]]  ;;  %s3255_s15 = sld [smem:[#allocation24_spill]] }
  0xa7   : > { %s291_s10 = sand.u32 1, %s2370_s5  }
  0xa8   : > { %s292_s19 = scalar_lea.sflag [#allocation7], %s291_s10 }
  0xac   : > { %s293_s0 = sand.u32 1, %s3254_s11   ;;  %p3256_p8 = scmp.ne.s32.totalorder %s3255_s15, 0 }
  0xad   : > { %s1721_s2 = sshll.u32 %s293_s0, 9 }
  0xae   : > { %s2650_s7 = scalar_lea.vmem [#allocation6], %s1721_s2 }
  0xaf   : > { %2180 = dma.done.wait (%p3256_p8), %s292_s19, 8192  }
  0xb0   : > { %2182 = vsyncadd (%p3256_p8), %s292_s19, 4294959104  ;;  %s3257_s1 = sld [smem:[#allocation15_spill]]  ;;  %p3258_p5 = scmp.ne.s32.totalorder %s3246_s6, 0 }
  0xb6   : > { %s302_s4 = sand.u32 1, %s3257_s1  }
  0xb7   : > { %s1722_s16 = sshll.u32 %s302_s4, 9 }
  0xb8   : > { %s2659_s8 = scalar_lea.vmem [#allocation8], %s1722_s16 }
  0xb9   : > { %2184 = dma.done.wait (%p3258_p5), %s292_s19, 8192  }
  0xba   : > { %2186 = vsyncadd (%p3258_p5), %s292_s19, 4294959104  ;;  %s3259_s5 = sld [smem:[#allocation18_spill]]  ;;  %s3260_s21 = sld [smem:[#allocation29_spill]] }
  0xbb   : > { %s2676_s11 = scalar_lea.vmem [#allocation9], %s1722_s16  ;;  %s3261_s15 = sld [smem:[#allocation17_spill]] }
  0xc0   : > { %s2666_s26 = sshll.u32 %s3259_s5, 1 }
  0xc1   : > { %p348_p2 = scmp.lt.s32.totalorder %s2666_s26, 3  ;;  %p1725_p4 = scmp.ne.s32.totalorder %s3261_s15, 0 }
  0xc2   : > { %v2261_v0 = vmov (!%p1725_p4), 0.0  }
  0xc3   : > { %s2670_s12 = scalar_select %p348_p2, %s2666_s26, 3 }
  0xc4   : > { %359 = sbr.rel (%p1725_p4) target bundleno = 228 (0xe4), region = 52  ;;  %360 = vst [vmem:[#allocation2] sm:$0xff] (!%p1725_p4), %v2261_v0  ;;  %361 = vst [vmem:[#allocation2 + $0x8] sm:$0xff] (!%p1725_p4), %v2261_v0 }
  0xc5   : > { %s350_s25 = scalar_lea.vmem %s3260_s21, %s2670_s12  ;;  %362 = vst [vmem:[#allocation2 + $0x10] sm:$0xff] (!%p1725_p4), %v2261_v0  ;;  %363 = vst [vmem:[#allocation2 + $0x18] sm:$0xff] (!%p1725_p4), %v2261_v0 }
  0xc6   : > { %364 = vst [vmem:[#allocation2 + $0x20] sm:$0xff] (!%p1725_p4), %v2261_v0  ;;  %365 = vst [vmem:[#allocation2 + $0x28] sm:$0xff] (!%p1725_p4), %v2261_v0 }
  0xc7   : > { %366 = vst [vmem:[#allocation2 + $0x30] sm:$0xff] (!%p1725_p4), %v2261_v0  ;;  %367 = vst [vmem:[#allocation2 + $0x38] sm:$0xff] (!%p1725_p4), %v2261_v0 }
  0xc8   : > { %368 = vst [vmem:[#allocation2 + $0x40] sm:$0xff] (!%p1725_p4), %v2261_v0  ;;  %369 = vst [vmem:[#allocation2 + $0x48] sm:$0xff] (!%p1725_p4), %v2261_v0 }
  0xc9   : > { %370 = vst [vmem:[#allocation2 + $0x50] sm:$0xff] (!%p1725_p4), %v2261_v0  ;;  %371 = vst [vmem:[#allocation2 + $0x58] sm:$0xff] (!%p1725_p4), %v2261_v0 }
  0xca   : > { %372 = vst [vmem:[#allocation2 + $0x60] sm:$0xff] (!%p1725_p4), %v2261_v0  ;;  %373 = vst [vmem:[#allocation2 + $0x68] sm:$0xff] (!%p1725_p4), %v2261_v0 }
  0xcb   : > { %374 = vst [vmem:[#allocation2 + $0x70] sm:$0xff] %v2261_v0  ;;  %375 = vst [vmem:[#allocation2 + $0x78] sm:$0xff] %v2261_v0 }
  0xcc   : > { %376 = vst [vmem:[#allocation2 + $0x80] sm:$0xff] %v2261_v0  ;;  %377 = vst [vmem:[#allocation2 + $0x88] sm:$0xff] %v2261_v0 }
  0xcd   : > { %378 = vst [vmem:[#allocation2 + $0x90] sm:$0xff] %v2261_v0  ;;  %379 = vst [vmem:[#allocation2 + $0x98] sm:$0xff] %v2261_v0 }
  0xce   : > { %380 = vst [vmem:[#allocation2 + $0xa0] sm:$0xff] %v2261_v0  ;;  %381 = vst [vmem:[#allocation2 + $0xa8] sm:$0xff] %v2261_v0 }
  0xcf   : > { %382 = vst [vmem:[#allocation2 + $0xb0] sm:$0xff] %v2261_v0  ;;  %383 = vst [vmem:[#allocation2 + $0xb8] sm:$0xff] %v2261_v0 }
  0xd0   : > { %384 = vst [vmem:[#allocation2 + $0xc0] sm:$0xff] %v2261_v0  ;;  %385 = vst [vmem:[#allocation2 + $0xc8] sm:$0xff] %v2261_v0 }
  0xd1   : > { %386 = vst [vmem:[#allocation2 + $0xd0] sm:$0xff] %v2261_v0  ;;  %387 = vst [vmem:[#allocation2 + $0xd8] sm:$0xff] %v2261_v0 }
  0xd2   : > { %388 = vst [vmem:[#allocation2 + $0xe0] sm:$0xff] %v2261_v0  ;;  %389 = vst [vmem:[#allocation2 + $0xe8] sm:$0xff] %v2261_v0 }
  0xd3   : > { %390 = vst [vmem:[#allocation2 + $0xf0] sm:$0xff] %v2261_v0  ;;  %391 = vst [vmem:[#allocation2 + $0xf8] sm:$0xff] %v2261_v0 }
  0xd4   : > { %392 = vst [vmem:[#allocation2 + $0x100] sm:$0xff] %v2261_v0  ;;  %393 = vst [vmem:[#allocation2 + $0x108] sm:$0xff] %v2261_v0 }
  0xd5   : > { %394 = vst [vmem:[#allocation2 + $0x110] sm:$0xff] %v2261_v0  ;;  %395 = vst [vmem:[#allocation2 + $0x118] sm:$0xff] %v2261_v0 }
  0xd6   : > { %396 = vst [vmem:[#allocation2 + $0x120] sm:$0xff] %v2261_v0  ;;  %397 = vst [vmem:[#allocation2 + $0x128] sm:$0xff] %v2261_v0 }
  0xd7   : > { %398 = vst [vmem:[#allocation2 + $0x130] sm:$0xff] %v2261_v0  ;;  %399 = vst [vmem:[#allocation2 + $0x138] sm:$0xff] %v2261_v0 }
  0xd8   : > { %400 = vst [vmem:[#allocation2 + $0x140] sm:$0xff] %v2261_v0  ;;  %401 = vst [vmem:[#allocation2 + $0x148] sm:$0xff] %v2261_v0 }
  0xd9   : > { %402 = vst [vmem:[#allocation2 + $0x150] sm:$0xff] %v2261_v0  ;;  %403 = vst [vmem:[#allocation2 + $0x158] sm:$0xff] %v2261_v0 }
  0xda   : > { %404 = vst [vmem:[#allocation2 + $0x160] sm:$0xff] %v2261_v0  ;;  %405 = vst [vmem:[#allocation2 + $0x168] sm:$0xff] %v2261_v0 }
  0xdb   : > { %406 = vst [vmem:[#allocation2 + $0x170] sm:$0xff] %v2261_v0  ;;  %407 = vst [vmem:[#allocation2 + $0x178] sm:$0xff] %v2261_v0 }
  0xdc   : > { %408 = vst [vmem:[#allocation2 + $0x180] sm:$0xff] %v2261_v0  ;;  %409 = vst [vmem:[#allocation2 + $0x188] sm:$0xff] %v2261_v0 }
  0xdd   : > { %410 = vst [vmem:[#allocation2 + $0x190] sm:$0xff] %v2261_v0  ;;  %411 = vst [vmem:[#allocation2 + $0x198] sm:$0xff] %v2261_v0 }
  0xde   : > { %412 = vst [vmem:[#allocation2 + $0x1a0] sm:$0xff] %v2261_v0  ;;  %413 = vst [vmem:[#allocation2 + $0x1a8] sm:$0xff] %v2261_v0 }
  0xdf   : > { %414 = vst [vmem:[#allocation2 + $0x1b0] sm:$0xff] %v2261_v0  ;;  %415 = vst [vmem:[#allocation2 + $0x1b8] sm:$0xff] %v2261_v0 }
  0xe0   : > { %416 = vst [vmem:[#allocation2 + $0x1c0] sm:$0xff] %v2261_v0  ;;  %417 = vst [vmem:[#allocation2 + $0x1c8] sm:$0xff] %v2261_v0 }
  0xe1   : > { %418 = vst [vmem:[#allocation2 + $0x1d0] sm:$0xff] %v2261_v0  ;;  %419 = vst [vmem:[#allocation2 + $0x1d8] sm:$0xff] %v2261_v0 }
  0xe2   : > { %420 = vst [vmem:[#allocation2 + $0x1e0] sm:$0xff] %v2261_v0  ;;  %421 = vst [vmem:[#allocation2 + $0x1e8] sm:$0xff] %v2261_v0 }
  0xe3   : > { %422 = vst [vmem:[#allocation2 + $0x1f0] sm:$0xff] %v2261_v0  ;;  %423 = vst [vmem:[#allocation2 + $0x1f8] sm:$0xff] %v2261_v0 }
  0xe4 PF: > { %v553_v1 = vld [vmem:[%s2650_s7 + $0x8] sm:$0xff]  ;;  %v555_v2 = vld [vmem:[%s2650_s7 + $0x18] sm:$0xff]  ;;  %v552_v3 = vld [vmem:[%s2650_s7] sm:$0xff]  ;;  %s3262_s6 = sld [smem:[#allocation17_spill]] }
  0xe5   : > { %v1738_v4 = vpack.c.bf16 %v555_v2, %v553_v1  ;;  %v554_v5 = vld [vmem:[%s2650_s7 + $0x10] sm:$0xff]  ;;  %v557_v6 = vld [vmem:[%s2650_s7 + $0x28] sm:$0xff]  ;;  %v559_v7 = vld [vmem:[%s2650_s7 + $0x38] sm:$0xff] }
  0xe6   : > { %v1740_v8 = vpack.c.bf16 %v554_v5, %v552_v3  ;;  %v1742_v9 = vpack.c.bf16 %v559_v7, %v557_v6  ;;  %v556_v10 = vld [vmem:[%s2650_s7 + $0x20] sm:$0xff]  ;;  %v558_v11 = vld [vmem:[%s2650_s7 + $0x30] sm:$0xff]  ;;  %v561_v12 = vld [vmem:[%s2650_s7 + $0x48] sm:$0xff] }
  0xe7   : > { %1739 = vmatprep.subr.bf16.mxu0 %v1738_v4  ;;  %1802 = vmatprep.subr.bf16.mxu1 %v1738_v4  ;;  %v563_v13 = vld [vmem:[%s2650_s7 + $0x58] sm:$0xff]  ;;  %v1744_v14 = vpack.c.bf16 %v558_v11, %v556_v10  ;;  %v560_v16 = vld [vmem:[%s2650_s7 + $0x40] sm:$0xff]  ;;  %v562_v17 = vld [vmem:[%s2650_s7 + $0x50] sm:$0xff] }
  0xe8   : > { %1741 = vmatpush1.bf16.xpose.msra.mxu0 %v1740_v8  ;;  %1818 = vmatpush1.bf16.xpose.msra.mxu1 %v1740_v8  ;;  %v1746_v15 = vpack.c.bf16 %v563_v13, %v561_v12  ;;  %v565_v18 = vld [vmem:[%s2650_s7 + $0x68] sm:$0xff]  ;;  %v567_v19 = vld [vmem:[%s2650_s7 + $0x78] sm:$0xff]  ;;  %v1748_v20 = vpack.c.bf16 %v562_v17, %v560_v16  ;;  %v564_v22 = vld [vmem:[%s2650_s7 + $0x60] sm:$0xff] }
  0xe9   : > { %1743 = vmatprep.subr.bf16.mxu0 %v1742_v9  ;;  %1803 = vmatprep.subr.bf16.mxu1 %v1742_v9  ;;  %v1750_v21 = vpack.c.bf16 %v567_v19, %v565_v18  ;;  %v566_v23 = vld [vmem:[%s2650_s7 + $0x70] sm:$0xff]  ;;  %v489_v24 = vld [vmem:[%s2642_s9 + $0x8] sm:$0xff]  ;;  %v571_v27 = vld [vmem:[%s2650_s7 + $0x98] sm:$0xff] }
  0xea   : > { %v521_v25 = vld [vmem:[%s2642_s9 + $0x108] sm:$0xff]  ;;  %680 = vmatprep.mubr.f32.mxu0 %v489_v24  ;;  %v1752_v28 = vpack.c.bf16 %v566_v23, %v564_v22  ;;  %v568_v30 = vld [vmem:[%s2650_s7 + $0x80] sm:$0xff]  ;;  %v570_v31 = vld [vmem:[%s2650_s7 + $0x90] sm:$0xff]  ;;  %p1726_p10 = scmp.ne.s32.totalorder %s3262_s6, 1 }
  0xeb   : > { %v569_v26 = vld [vmem:[%s2650_s7 + $0x88] sm:$0xff]  ;;  %776 = vmatprep.mubr.f32.mxu1 %v521_v25  ;;  %v575_v33 = vld [vmem:[%s2650_s7 + $0xb8] sm:$0xff]  ;;  %v1756_v34 = vpack.c.bf16 %v570_v31, %v568_v30  ;;  %v572_v36 = vld [vmem:[%s2650_s7 + $0xa0] sm:$0xff] }
  0xec   : > { %v1754_v29 = vpack.c.bf16 %v571_v27, %v569_v26  ;;  %v573_v32 = vld [vmem:[%s2650_s7 + $0xa8] sm:$0xff]  ;;  %v574_v37 = vld [vmem:[%s2650_s7 + $0xb0] sm:$0xff]  ;;  %v579_v39 = vld [vmem:[%s2650_s7 + $0xd8] sm:$0xff] }
  0xed   : > { %v1758_v35 = vpack.c.bf16 %v575_v33, %v573_v32  ;;  %v577_v38 = vld [vmem:[%s2650_s7 + $0xc8] sm:$0xff]  ;;  %v1760_v40 = vpack.c.bf16 %v574_v37, %v572_v36  ;;  %v576_v42 = vld [vmem:[%s2650_s7 + $0xc0] sm:$0xff]  ;;  %v578_v43 = vld [vmem:[%s2650_s7 + $0xd0] sm:$0xff] }
  0xee   : > { %v1762_v41 = vpack.c.bf16 %v579_v39, %v577_v38  ;;  %v581_v44 = vld [vmem:[%s2650_s7 + $0xe8] sm:$0xff]  ;;  %v583_v45 = vld [vmem:[%s2650_s7 + $0xf8] sm:$0xff]  ;;  %v1764_v46 = vpack.c.bf16 %v578_v43, %v576_v42  ;;  %v580_v48 = vld [vmem:[%s2650_s7 + $0xe0] sm:$0xff] }
  0xef   : > { %v1766_v47 = vpack.c.bf16 %v583_v45, %v581_v44  ;;  %v582_v49 = vld [vmem:[%s2650_s7 + $0xf0] sm:$0xff]  ;;  %v585_v50 = vld [vmem:[%s2650_s7 + $0x108] sm:$0xff]  ;;  %v587_v51 = vld [vmem:[%s2650_s7 + $0x118] sm:$0xff] }
  0xf0   : > { %1745 = vmatpush1.bf16.xpose.msra.mxu0 %v1744_v14  ;;  %1819 = vmatpush1.bf16.xpose.msra.mxu1 %v1744_v14  ;;  %v1768_v52 = vpack.c.bf16 %v582_v49, %v580_v48  ;;  %v1770_v53 = vpack.c.bf16 %v587_v51, %v585_v50  ;;  %v584_v54 = vld [vmem:[%s2650_s7 + $0x100] sm:$0xff]  ;;  %v586_v55 = vld [vmem:[%s2650_s7 + $0x110] sm:$0xff]  ;;  %v589_v56 = vld [vmem:[%s2650_s7 + $0x128] sm:$0xff] }
  0xf1   : > { %1747 = vmatprep.subr.bf16.mxu0 %v1746_v15  ;;  %1804 = vmatprep.subr.bf16.mxu1 %v1746_v15  ;;  %v591_v57 = vld [vmem:[%s2650_s7 + $0x138] sm:$0xff]  ;;  %v1772_v58 = vpack.c.bf16 %v586_v55, %v584_v54  ;;  %v588_v60 = vld [vmem:[%s2650_s7 + $0x120] sm:$0xff]  ;;  %v590_v61 = vld [vmem:[%s2650_s7 + $0x130] sm:$0xff] }
  0xf2   : > { %v1774_v59 = vpack.c.bf16 %v591_v57, %v589_v56  ;;  %v593_v62 = vld [vmem:[%s2650_s7 + $0x148] sm:$0xff]  ;;  %v595_v63 = vld [vmem:[%s2650_s7 + $0x158] sm:$0xff]  ;;  %v1776_v0 = vpack.c.bf16 %v590_v61, %v588_v60  ;;  %v592_v2 = vld [vmem:[%s2650_s7 + $0x140] sm:$0xff] }
  0xf3   : > { %v1778_v1 = vpack.c.bf16 %v595_v63, %v593_v62  ;;  %v594_v3 = vld [vmem:[%s2650_s7 + $0x150] sm:$0xff]  ;;  %v597_v4 = vld [vmem:[%s2650_s7 + $0x168] sm:$0xff]  ;;  %v599_v5 = vld [vmem:[%s2650_s7 + $0x178] sm:$0xff] }
  0xf4   : > { %v1780_v6 = vpack.c.bf16 %v594_v3, %v592_v2  ;;  %v1782_v7 = vpack.c.bf16 %v599_v5, %v597_v4  ;;  %v596_v8 = vld [vmem:[%s2650_s7 + $0x160] sm:$0xff]  ;;  %v598_v9 = vld [vmem:[%s2650_s7 + $0x170] sm:$0xff]  ;;  %v601_v10 = vld [vmem:[%s2650_s7 + $0x188] sm:$0xff] }
  0xf5   : > { %v603_v11 = vld [vmem:[%s2650_s7 + $0x198] sm:$0xff]  ;;  %v1784_v12 = vpack.c.bf16 %v598_v9, %v596_v8  ;;  %v600_v14 = vld [vmem:[%s2650_s7 + $0x180] sm:$0xff]  ;;  %v602_v15 = vld [vmem:[%s2650_s7 + $0x190] sm:$0xff] }
  0xf6   : > { %v1786_v13 = vpack.c.bf16 %v603_v11, %v601_v10  ;;  %v605_v16 = vld [vmem:[%s2650_s7 + $0x1a8] sm:$0xff]  ;;  %v607_v17 = vld [vmem:[%s2650_s7 + $0x1b8] sm:$0xff]  ;;  %v1788_v18 = vpack.c.bf16 %v602_v15, %v600_v14  ;;  %v608_v26 = vld [vmem:[%s2650_s7 + $0x1c0] sm:$0xff] }
  0xf7   : > { %v1790_v19 = vpack.c.bf16 %v607_v17, %v605_v16  ;;  %v609_v22 = vld [vmem:[%s2650_s7 + $0x1c8] sm:$0xff]  ;;  %v611_v23 = vld [vmem:[%s2650_s7 + $0x1d8] sm:$0xff]  ;;  %v610_v27 = vld [vmem:[%s2650_s7 + $0x1d0] sm:$0xff] }
  0xf8   : > { %1749 = vmatpush1.bf16.xpose.msra.mxu0 %v1748_v20  ;;  %1820 = vmatpush1.bf16.xpose.msra.mxu1 %v1748_v20  ;;  %v604_v20 = vld [vmem:[%s2650_s7 + $0x1a0] sm:$0xff]  ;;  %v1794_v25 = vpack.c.bf16 %v611_v23, %v609_v22  ;;  %v1796_v30 = vpack.c.bf16 %v610_v27, %v608_v26  ;;  %v614_v33 = vld [vmem:[%s2650_s7 + $0x1f0] sm:$0xff]  ;;  %v491_v37 = vld [vmem:[%s2642_s9 + $0x18] sm:$0xff] }
  0xf9   : > { %1751 = vmatprep.subr.bf16.mxu0 %v1750_v21  ;;  %1805 = vmatprep.subr.bf16.mxu1 %v1750_v21  ;;  %v606_v21 = vld [vmem:[%s2650_s7 + $0x1b0] sm:$0xff]  ;;  %v612_v32 = vld [vmem:[%s2650_s7 + $0x1e0] sm:$0xff]  ;;  %v523_v38 = vld [vmem:[%s2642_s9 + $0x118] sm:$0xff] }
  0xfa   : > { %v1792_v24 = vpack.c.bf16 %v606_v21, %v604_v20  ;;  %v520_v36 = vld [vmem:[%s2642_s9 + $0x100] sm:$0xff]  ;;  %v490_v39 = vld [vmem:[%s2642_s9 + $0x10] sm:$0xff]  ;;  %v525_v42 = vld [vmem:[%s2642_s9 + $0x128] sm:$0xff] }
  0xfb   : > { %v492_v43 = vld [vmem:[%s2642_s9 + $0x20] sm:$0xff]  ;;  %v495_v45 = vld [vmem:[%s2642_s9 + $0x38] sm:$0xff]  ;;  %v526_v48 = vld [vmem:[%s2642_s9 + $0x130] sm:$0xff] }
  0xfc   : > { %v524_v44 = vld [vmem:[%s2642_s9 + $0x120] sm:$0xff]  ;;  %v497_v49 = vld [vmem:[%s2642_s9 + $0x48] sm:$0xff]  ;;  %v531_v54 = vld [vmem:[%s2642_s9 + $0x158] sm:$0xff] }
  0xfd   : > { %v529_v50 = vld [vmem:[%s2642_s9 + $0x148] sm:$0xff]  ;;  %v496_v51 = vld [vmem:[%s2642_s9 + $0x40] sm:$0xff]  ;;  %v498_v55 = vld [vmem:[%s2642_s9 + $0x50] sm:$0xff] }
  0xfe   : > { %v530_v56 = vld [vmem:[%s2642_s9 + $0x150] sm:$0xff]  ;;  %v501_v57 = vld [vmem:[%s2642_s9 + $0x68] sm:$0xff]  ;;  %v532_v60 = vld [vmem:[%s2642_s9 + $0x160] sm:$0xff] }
  0xff   : > { %v503_v61 = vld [vmem:[%s2642_s9 + $0x78] sm:$0xff]  ;;  %v502_v63 = vld [vmem:[%s2642_s9 + $0x70] sm:$0xff]  ;;  %v537_v2 = vld [vmem:[%s2642_s9 + $0x188] sm:$0xff] }
 0x100   : > { %1753 = vmatpush1.bf16.xpose.msra.mxu0 %v1752_v28  ;;  %1821 = vmatpush1.bf16.xpose.msra.mxu1 %v1752_v28  ;;  %v613_v28 = vld [vmem:[%s2650_s7 + $0x1e8] sm:$0xff]  ;;  %v535_v62 = vld [vmem:[%s2642_s9 + $0x178] sm:$0xff]  ;;  %v504_v3 = vld [vmem:[%s2642_s9 + $0x80] sm:$0xff] }
 0x101   : > { %1755 = vmatprep.subr.bf16.mxu0 %v1754_v29  ;;  %1806 = vmatprep.subr.bf16.mxu1 %v1754_v29  ;;  %v615_v29 = vld [vmem:[%s2650_s7 + $0x1f8] sm:$0xff]  ;;  %v536_v4 = vld [vmem:[%s2642_s9 + $0x180] sm:$0xff]  ;;  %v538_v8 = vld [vmem:[%s2642_s9 + $0x190] sm:$0xff] }
 0x102   : > { %v1798_v31 = vpack.c.bf16 %v615_v29, %v613_v28  ;;  %v507_v5 = vld [vmem:[%s2642_s9 + $0x98] sm:$0xff]  ;;  %v509_v9 = vld [vmem:[%s2642_s9 + $0xa8] sm:$0xff]  ;;  %v508_v11 = vld [vmem:[%s2642_s9 + $0xa0] sm:$0xff] }
 0x103   : > { %v541_v10 = vld [vmem:[%s2642_s9 + $0x1a8] sm:$0xff]  ;;  %v543_v14 = vld [vmem:[%s2642_s9 + $0x1b8] sm:$0xff]  ;;  %v510_v15 = vld [vmem:[%s2642_s9 + $0xb0] sm:$0xff] }
 0x104   : > { %v542_v16 = vld [vmem:[%s2642_s9 + $0x1b0] sm:$0xff]  ;;  %v513_v17 = vld [vmem:[%s2642_s9 + $0xc8] sm:$0xff]  ;;  %v544_v20 = vld [vmem:[%s2642_s9 + $0x1c0] sm:$0xff] }
 0x105   : > { %v515_v21 = vld [vmem:[%s2642_s9 + $0xd8] sm:$0xff]  ;;  %v514_v23 = vld [vmem:[%s2642_s9 + $0xd0] sm:$0xff]  ;;  %v549_v26 = vld [vmem:[%s2642_s9 + $0x1e8] sm:$0xff] }
 0x106   : > { %v547_v22 = vld [vmem:[%s2642_s9 + $0x1d8] sm:$0xff]  ;;  %v516_v27 = vld [vmem:[%s2642_s9 + $0xe0] sm:$0xff] }
 0x107   : > { %v548_v28 = vld [vmem:[%s2642_s9 + $0x1e0] sm:$0xff]  ;;  %v519_v29 = vld [vmem:[%s2642_s9 + $0xf8] sm:$0xff] }
 0x108   : > { %1757 = vmatpush1.bf16.xpose.msra.mxu0 %v1756_v34  ;;  %1822 = vmatpush1.bf16.xpose.msra.mxu1 %v1756_v34  ;;  %v1800_v34 = vpack.c.bf16 %v614_v33, %v612_v32  ;;  %v550_v32 = vld [vmem:[%s2642_s9 + $0x1f0] sm:$0xff]  ;;  %v424_v33 = vld [vmem:[#allocation2] sm:$0xff] }
 0x109   : > { %1759 = vmatprep.subr.bf16.mxu0 %v1758_v35  ;;  %1807 = vmatprep.subr.bf16.mxu1 %v1758_v35  ;;  %v488_v35 = vld [vmem:[%s2642_s9] sm:$0xff] }
 0x110   : > { %1761 = vmatpush1.bf16.xpose.msra.mxu0 %v1760_v40  ;;  %1823 = vmatpush1.bf16.xpose.msra.mxu1 %v1760_v40  ;;  %v522_v40 = vld [vmem:[%s2642_s9 + $0x110] sm:$0xff] }
 0x111   : > { %1763 = vmatprep.subr.bf16.mxu0 %v1762_v41  ;;  %1808 = vmatprep.subr.bf16.mxu1 %v1762_v41  ;;  %v493_v41 = vld [vmem:[%s2642_s9 + $0x28] sm:$0xff] }
 0x118   : > { %1765 = vmatpush1.bf16.xpose.msra.mxu0 %v1764_v46  ;;  %1824 = vmatpush1.bf16.xpose.msra.mxu1 %v1764_v46  ;;  %v527_v46 = vld [vmem:[%s2642_s9 + $0x138] sm:$0xff] }
 0x119   : > { %1767 = vmatprep.subr.bf16.mxu0 %v1766_v47  ;;  %1809 = vmatprep.subr.bf16.mxu1 %v1766_v47  ;;  %v494_v47 = vld [vmem:[%s2642_s9 + $0x30] sm:$0xff] }
 0x120   : > { %1769 = vmatpush1.bf16.xpose.msra.mxu0 %v1768_v52  ;;  %1825 = vmatpush1.bf16.xpose.msra.mxu1 %v1768_v52  ;;  %v528_v52 = vld [vmem:[%s2642_s9 + $0x140] sm:$0xff] }
 0x121   : > { %1771 = vmatprep.subr.bf16.mxu0 %v1770_v53  ;;  %1810 = vmatprep.subr.bf16.mxu1 %v1770_v53  ;;  %v499_v53 = vld [vmem:[%s2642_s9 + $0x58] sm:$0xff] }
 0x128   : > { %1773 = vmatpush1.bf16.xpose.msra.mxu0 %v1772_v58  ;;  %1826 = vmatpush1.bf16.xpose.msra.mxu1 %v1772_v58  ;;  %v533_v58 = vld [vmem:[%s2642_s9 + $0x168] sm:$0xff] }
 0x129   : > { %1775 = vmatprep.subr.bf16.mxu0 %v1774_v59  ;;  %1811 = vmatprep.subr.bf16.mxu1 %v1774_v59  ;;  %v500_v59 = vld [vmem:[%s2642_s9 + $0x60] sm:$0xff] }
 0x130   : > { %1777 = vmatpush1.bf16.xpose.msra.mxu0 %v1776_v0  ;;  %1827 = vmatpush1.bf16.xpose.msra.mxu1 %v1776_v0  ;;  %v534_v0 = vld [vmem:[%s2642_s9 + $0x170] sm:$0xff] }
 0x131   : > { %1779 = vmatprep.subr.bf16.mxu0 %v1778_v1  ;;  %1812 = vmatprep.subr.bf16.mxu1 %v1778_v1  ;;  %v505_v1 = vld [vmem:[%s2642_s9 + $0x88] sm:$0xff] }
 0x138   : > { %1781 = vmatpush1.bf16.xpose.msra.mxu0 %v1780_v6  ;;  %1828 = vmatpush1.bf16.xpose.msra.mxu1 %v1780_v6  ;;  %v539_v6 = vld [vmem:[%s2642_s9 + $0x198] sm:$0xff] }
 0x139   : > { %1783 = vmatprep.subr.bf16.mxu0 %v1782_v7  ;;  %1813 = vmatprep.subr.bf16.mxu1 %v1782_v7  ;;  %v506_v7 = vld [vmem:[%s2642_s9 + $0x90] sm:$0xff] }
 0x140   : > { %1785 = vmatpush1.bf16.xpose.msra.mxu0 %v1784_v12  ;;  %1829 = vmatpush1.bf16.xpose.msra.mxu1 %v1784_v12  ;;  %v540_v12 = vld [vmem:[%s2642_s9 + $0x1a0] sm:$0xff] }
 0x141   : > { %1787 = vmatprep.subr.bf16.mxu0 %v1786_v13  ;;  %1814 = vmatprep.subr.bf16.mxu1 %v1786_v13  ;;  %v511_v13 = vld [vmem:[%s2642_s9 + $0xb8] sm:$0xff] }
 0x148   : > { %1789 = vmatpush1.bf16.xpose.msra.mxu0 %v1788_v18  ;;  %1830 = vmatpush1.bf16.xpose.msra.mxu1 %v1788_v18  ;;  %v545_v18 = vld [vmem:[%s2642_s9 + $0x1c8] sm:$0xff] }
 0x149   : > { %1791 = vmatprep.subr.bf16.mxu0 %v1790_v19  ;;  %1815 = vmatprep.subr.bf16.mxu1 %v1790_v19  ;;  %v512_v19 = vld [vmem:[%s2642_s9 + $0xc0] sm:$0xff] }
 0x150   : > { %1793 = vmatpush1.bf16.xpose.msra.mxu0 %v1792_v24  ;;  %1831 = vmatpush1.bf16.xpose.msra.mxu1 %v1792_v24  ;;  %v546_v24 = vld [vmem:[%s2642_s9 + $0x1d0] sm:$0xff] }
 0x151   : > { %1795 = vmatprep.subr.bf16.mxu0 %v1794_v25  ;;  %1816 = vmatprep.subr.bf16.mxu1 %v1794_v25  ;;  %v517_v25 = vld [vmem:[%s2642_s9 + $0xe8] sm:$0xff] }
 0x158   : > { %1797 = vmatpush1.bf16.xpose.msra.mxu0 %v1796_v30  ;;  %1832 = vmatpush1.bf16.xpose.msra.mxu1 %v1796_v30  ;;  %v551_v30 = vld [vmem:[%s2642_s9 + $0x1f8] sm:$0xff] }
 0x159   : > { %1799 = vmatprep.subr.bf16.mxu0 %v1798_v31  ;;  %1817 = vmatprep.subr.bf16.mxu1 %v1798_v31  ;;  %v518_v31 = vld [vmem:[%s2642_s9 + $0xf0] sm:$0xff] }
 0x160   : > { %1801 = vmatpush1.bf16.xpose.msra.mxu0 %v1800_v34  ;;  %1833 = vmatpush1.bf16.xpose.msra.mxu1 %v1800_v34  ;;  %v456_v34 = vld [vmem:[#allocation2 + $0x100] sm:$0xff] }
 0x167   : > { %681 = vmatmul.mubr.f32.vlgmr.msra.gmra.mrb[0].mxu0 %v488_v35  ;;  %777 = vmatmul.mubr.f32.vlgmr.msra.gmra.mrb[0].mxu1 %v520_v36  ;;  %v425_v35 = vld [vmem:[#allocation2 + $0x8] sm:$0xff] }
 0x168   : > { %686 = vmatprep.mubr.f32.mxu0 %v491_v37  ;;  %782 = vmatprep.mubr.f32.mxu1 %v523_v38  ;;  %v457_v36 = vld [vmem:[#allocation2 + $0x108] sm:$0xff] }
 0x16b   : > { %687 = vmatmul.mubr.f32.gmra.mrb[2].mxu0 %v490_v39  ;;  %783 = vmatmul.mubr.f32.gmra.mrb[2].mxu1 %v522_v40 }
 0x16c   : > { %692 = vmatprep.mubr.f32.mxu0 %v493_v41  ;;  %788 = vmatprep.mubr.f32.mxu1 %v525_v42 }
 0x16f   : > { %693 = vmatmul.mubr.f32.gmra.mrb[4].mxu0 %v492_v43  ;;  %789 = vmatmul.mubr.f32.gmra.mrb[4].mxu1 %v524_v44 }
 0x170   : > { %698 = vmatprep.mubr.f32.mxu0 %v495_v45  ;;  %794 = vmatprep.mubr.f32.mxu1 %v527_v46  ;;  %v426_v45 = vld [vmem:[#allocation2 + $0x10] sm:$0xff] }
 0x171   : > { %v458_v46 = vld [vmem:[#allocation2 + $0x110] sm:$0xff] }
 0x173   : > { %699 = vmatmul.mubr.f32.gmra.mrb[6].mxu0 %v494_v47  ;;  %795 = vmatmul.mubr.f32.gmra.mrb[6].mxu1 %v526_v48  ;;  %v427_v47 = vld [vmem:[#allocation2 + $0x18] sm:$0xff] }
 0x174   : > { %704 = vmatprep.mubr.f32.mxu0 %v497_v49  ;;  %800 = vmatprep.mubr.f32.mxu1 %v529_v50  ;;  %v459_v48 = vld [vmem:[#allocation2 + $0x118] sm:$0xff] }
 0x177   : > { %705 = vmatmul.mubr.f32.gmra.mrb[8].mxu0 %v496_v51  ;;  %801 = vmatmul.mubr.f32.gmra.mrb[8].mxu1 %v528_v52 }
 0x178   : > { %710 = vmatprep.mubr.f32.mxu0 %v499_v53  ;;  %806 = vmatprep.mubr.f32.mxu1 %v531_v54 }
 0x17b   : > { %711 = vmatmul.mubr.f32.gmra.mrb[10].mxu0 %v498_v55  ;;  %807 = vmatmul.mubr.f32.gmra.mrb[10].mxu1 %v530_v56 }
 0x17c   : > { %716 = vmatprep.mubr.f32.mxu0 %v501_v57  ;;  %812 = vmatprep.mubr.f32.mxu1 %v533_v58  ;;  %v428_v57 = vld [vmem:[#allocation2 + $0x20] sm:$0xff] }
 0x17d   : > { %v460_v58 = vld [vmem:[#allocation2 + $0x120] sm:$0xff] }
 0x17f   : > { %717 = vmatmul.mubr.f32.gmra.mrb[12].mxu0 %v500_v59  ;;  %813 = vmatmul.mubr.f32.gmra.mrb[12].mxu1 %v532_v60  ;;  %v429_v59 = vld [vmem:[#allocation2 + $0x28] sm:$0xff] }
 0x180   : > { %722 = vmatprep.mubr.f32.mxu0 %v503_v61  ;;  %818 = vmatprep.mubr.f32.mxu1 %v535_v62  ;;  %v461_v60 = vld [vmem:[#allocation2 + $0x128] sm:$0xff] }
 0x183   : > { %723 = vmatmul.mubr.f32.gmra.mrb[14].mxu0 %v502_v63  ;;  %819 = vmatmul.mubr.f32.gmra.mrb[14].mxu1 %v534_v0 }
 0x184   : > { %728 = vmatprep.mubr.f32.mxu0 %v505_v1  ;;  %824 = vmatprep.mubr.f32.mxu1 %v537_v2 }
 0x187   : > { %729 = vmatmul.mubr.f32.gmra.mrb[16].mxu0 %v504_v3  ;;  %825 = vmatmul.mubr.f32.gmra.mrb[16].mxu1 %v536_v4 }
 0x188   : > { %734 = vmatprep.mubr.f32.mxu0 %v507_v5  ;;  %830 = vmatprep.mubr.f32.mxu1 %v539_v6  ;;  %v430_v5 = vld [vmem:[#allocation2 + $0x30] sm:$0xff] }
 0x189   : > { %v462_v6 = vld [vmem:[#allocation2 + $0x130] sm:$0xff] }
 0x18b   : > { %735 = vmatmul.mubr.f32.gmra.mrb[18].mxu0 %v506_v7  ;;  %831 = vmatmul.mubr.f32.gmra.mrb[18].mxu1 %v538_v8  ;;  %v431_v7 = vld [vmem:[#allocation2 + $0x38] sm:$0xff] }
 0x18c   : > { %740 = vmatprep.mubr.f32.mxu0 %v509_v9  ;;  %836 = vmatprep.mubr.f32.mxu1 %v541_v10  ;;  %v463_v8 = vld [vmem:[#allocation2 + $0x138] sm:$0xff] }
 0x18f   : > { %741 = vmatmul.mubr.f32.gmra.mrb[20].mxu0 %v508_v11  ;;  %837 = vmatmul.mubr.f32.gmra.mrb[20].mxu1 %v540_v12 }
 0x190   : > { %746 = vmatprep.mubr.f32.mxu0 %v511_v13  ;;  %842 = vmatprep.mubr.f32.mxu1 %v543_v14 }
 0x193   : > { %747 = vmatmul.mubr.f32.gmra.mrb[22].mxu0 %v510_v15  ;;  %843 = vmatmul.mubr.f32.gmra.mrb[22].mxu1 %v542_v16 }
 0x194   : > { %752 = vmatprep.mubr.f32.mxu0 %v513_v17  ;;  %848 = vmatprep.mubr.f32.mxu1 %v545_v18  ;;  %v432_v17 = vld [vmem:[#allocation2 + $0x40] sm:$0xff] }
 0x195   : > { %v464_v18 = vld [vmem:[#allocation2 + $0x140] sm:$0xff] }
 0x197   : > { %753 = vmatmul.mubr.f32.gmra.mrb[24].mxu0 %v512_v19  ;;  %849 = vmatmul.mubr.f32.gmra.mrb[24].mxu1 %v544_v20  ;;  %v433_v19 = vld [vmem:[#allocation2 + $0x48] sm:$0xff] }
 0x198   : > { %758 = vmatprep.mubr.f32.mxu0 %v515_v21  ;;  %854 = vmatprep.mubr.f32.mxu1 %v547_v22  ;;  %v465_v20 = vld [vmem:[#allocation2 + $0x148] sm:$0xff] }
 0x19b   : > { %759 = vmatmul.mubr.f32.gmra.mrb[26].mxu0 %v514_v23  ;;  %855 = vmatmul.mubr.f32.gmra.mrb[26].mxu1 %v546_v24 }
 0x19c   : > { %764 = vmatprep.mubr.f32.mxu0 %v517_v25  ;;  %860 = vmatprep.mubr.f32.mxu1 %v549_v26 }
 0x19f   : > { %765 = vmatmul.mubr.f32.gmra.mrb[28].mxu0 %v516_v27  ;;  %861 = vmatmul.mubr.f32.gmra.mrb[28].mxu1 %v548_v28 }
 0x1a0   : > { %770 = vmatprep.mubr.f32.mxu0 %v519_v29  ;;  %866 = vmatprep.mubr.f32.mxu1 %v551_v30  ;;  %v434_v29 = vld [vmem:[#allocation2 + $0x50] sm:$0xff] }
 0x1a1   : > { %v466_v30 = vld [vmem:[#allocation2 + $0x150] sm:$0xff] }
 0x1a3   : > { %771 = vmatmul.mubr.f32.gmra.mrb[30].mxu0 %v518_v31  ;;  %867 = vmatmul.mubr.f32.gmra.mrb[30].mxu1 %v550_v32  ;;  %v435_v31 = vld [vmem:[#allocation2 + $0x58] sm:$0xff] }
 0x1a4   : > { %v467_v32 = vld [vmem:[#allocation2 + $0x158] sm:$0xff] }
 0x23a   : > { %v682_v37 = vpop.f32.mrb[0].mxu0  ;;  %v778_v38 = vpop.f32.mrb[0].mxu1 }
 0x23b   : > { %v873_v39 = vadd.f32 %v682_v37, %v424_v33  ;;  %v905_v40 = vadd.f32 %v778_v38, %v456_v34  ;;  %v684_v41 = vpop.f32.mrb[1].mxu0  ;;  %v780_v42 = vpop.f32.mrb[1].mxu1 }
 0x23c   : > { %v874_v43 = vadd.f32 %v684_v41, %v425_v35  ;;  %v906_v44 = vadd.f32 %v780_v42, %v457_v36  ;;  %v436_v41 = vld [vmem:[#allocation2 + $0x60] sm:$0xff] }
 0x23d   : > { %937 = vst [vmem:[#allocation2] sm:$0xff] %v873_v39  ;;  %969 = vst [vmem:[#allocation2 + $0x100] sm:$0xff] %v905_v40  ;;  %v468_v42 = vld [vmem:[#allocation2 + $0x160] sm:$0xff] }
 0x23e   : > { %938 = vst [vmem:[#allocation2 + $0x8] sm:$0xff] %v874_v43  ;;  %970 = vst [vmem:[#allocation2 + $0x108] sm:$0xff] %v906_v44  ;;  %v688_v49 = vpop.f32.mrb[2].mxu0  ;;  %v784_v50 = vpop.f32.mrb[2].mxu1  ;;  %v437_v43 = vld [vmem:[#allocation2 + $0x68] sm:$0xff] }
 0x23f   : > { %v875_v51 = vadd.f32 %v688_v49, %v426_v45  ;;  %v907_v52 = vadd.f32 %v784_v50, %v458_v46  ;;  %v690_v53 = vpop.f32.mrb[3].mxu0  ;;  %v786_v54 = vpop.f32.mrb[3].mxu1  ;;  %v469_v44 = vld [vmem:[#allocation2 + $0x168] sm:$0xff] }
 0x240   : > { %v876_v55 = vadd.f32 %v690_v53, %v427_v47  ;;  %v908_v56 = vadd.f32 %v786_v54, %v459_v48  ;;  %v438_v53 = vld [vmem:[#allocation2 + $0x70] sm:$0xff] }
 0x241   : > { %939 = vst [vmem:[#allocation2 + $0x10] sm:$0xff] %v875_v51  ;;  %971 = vst [vmem:[#allocation2 + $0x110] sm:$0xff] %v907_v52  ;;  %v470_v54 = vld [vmem:[#allocation2 + $0x170] sm:$0xff] }
 0x242   : > { %940 = vst [vmem:[#allocation2 + $0x18] sm:$0xff] %v876_v55  ;;  %972 = vst [vmem:[#allocation2 + $0x118] sm:$0xff] %v908_v56  ;;  %v694_v61 = vpop.f32.mrb[4].mxu0  ;;  %v790_v62 = vpop.f32.mrb[4].mxu1  ;;  %v439_v55 = vld [vmem:[#allocation2 + $0x78] sm:$0xff] }
 0x243   : > { %v877_v63 = vadd.f32 %v694_v61, %v428_v57  ;;  %v909_v0 = vadd.f32 %v790_v62, %v460_v58  ;;  %v696_v1 = vpop.f32.mrb[5].mxu0  ;;  %v792_v2 = vpop.f32.mrb[5].mxu1  ;;  %v471_v56 = vld [vmem:[#allocation2 + $0x178] sm:$0xff] }
 0x244   : > { %v878_v3 = vadd.f32 %v696_v1, %v429_v59  ;;  %v910_v4 = vadd.f32 %v792_v2, %v461_v60  ;;  %v440_v1 = vld [vmem:[#allocation2 + $0x80] sm:$0xff] }
 0x245   : > { %941 = vst [vmem:[#allocation2 + $0x20] sm:$0xff] %v877_v63  ;;  %973 = vst [vmem:[#allocation2 + $0x120] sm:$0xff] %v909_v0  ;;  %v472_v2 = vld [vmem:[#allocation2 + $0x180] sm:$0xff] }
 0x246   : > { %942 = vst [vmem:[#allocation2 + $0x28] sm:$0xff] %v878_v3  ;;  %974 = vst [vmem:[#allocation2 + $0x128] sm:$0xff] %v910_v4  ;;  %v700_v9 = vpop.f32.mrb[6].mxu0  ;;  %v796_v10 = vpop.f32.mrb[6].mxu1  ;;  %v441_v3 = vld [vmem:[#allocation2 + $0x88] sm:$0xff] }
 0x247   : > { %v879_v11 = vadd.f32 %v700_v9, %v430_v5  ;;  %v911_v12 = vadd.f32 %v796_v10, %v462_v6  ;;  %v702_v13 = vpop.f32.mrb[7].mxu0  ;;  %v798_v14 = vpop.f32.mrb[7].mxu1  ;;  %v473_v4 = vld [vmem:[#allocation2 + $0x188] sm:$0xff] }
 0x248   : > { %v880_v15 = vadd.f32 %v702_v13, %v431_v7  ;;  %v912_v16 = vadd.f32 %v798_v14, %v463_v8  ;;  %v442_v13 = vld [vmem:[#allocation2 + $0x90] sm:$0xff] }
 0x249   : > { %943 = vst [vmem:[#allocation2 + $0x30] sm:$0xff] %v879_v11  ;;  %975 = vst [vmem:[#allocation2 + $0x130] sm:$0xff] %v911_v12  ;;  %v474_v14 = vld [vmem:[#allocation2 + $0x190] sm:$0xff] }
 0x24a   : > { %944 = vst [vmem:[#allocation2 + $0x38] sm:$0xff] %v880_v15  ;;  %976 = vst [vmem:[#allocation2 + $0x138] sm:$0xff] %v912_v16  ;;  %v706_v21 = vpop.f32.mrb[8].mxu0  ;;  %v802_v22 = vpop.f32.mrb[8].mxu1  ;;  %v443_v15 = vld [vmem:[#allocation2 + $0x98] sm:$0xff] }
 0x24b   : > { %v881_v23 = vadd.f32 %v706_v21, %v432_v17  ;;  %v913_v24 = vadd.f32 %v802_v22, %v464_v18  ;;  %v708_v25 = vpop.f32.mrb[9].mxu0  ;;  %v804_v26 = vpop.f32.mrb[9].mxu1  ;;  %v475_v16 = vld [vmem:[#allocation2 + $0x198] sm:$0xff] }
 0x24c   : > { %v882_v27 = vadd.f32 %v708_v25, %v433_v19  ;;  %v914_v28 = vadd.f32 %v804_v26, %v465_v20  ;;  %v444_v25 = vld [vmem:[#allocation2 + $0xa0] sm:$0xff] }
 0x24d   : > { %945 = vst [vmem:[#allocation2 + $0x40] sm:$0xff] %v881_v23  ;;  %977 = vst [vmem:[#allocation2 + $0x140] sm:$0xff] %v913_v24  ;;  %v476_v26 = vld [vmem:[#allocation2 + $0x1a0] sm:$0xff] }
 0x24e   : > { %946 = vst [vmem:[#allocation2 + $0x48] sm:$0xff] %v882_v27  ;;  %978 = vst [vmem:[#allocation2 + $0x148] sm:$0xff] %v914_v28  ;;  %v712_v33 = vpop.f32.mrb[10].mxu0  ;;  %v808_v34 = vpop.f32.mrb[10].mxu1  ;;  %v445_v27 = vld [vmem:[#allocation2 + $0xa8] sm:$0xff] }
 0x24f   : > { %v883_v35 = vadd.f32 %v712_v33, %v434_v29  ;;  %v915_v36 = vadd.f32 %v808_v34, %v466_v30  ;;  %v714_v37 = vpop.f32.mrb[11].mxu0  ;;  %v810_v38 = vpop.f32.mrb[11].mxu1  ;;  %v477_v28 = vld [vmem:[#allocation2 + $0x1a8] sm:$0xff] }
 0x250   : > { %v884_v39 = vadd.f32 %v714_v37, %v435_v31  ;;  %v916_v40 = vadd.f32 %v810_v38, %v467_v32  ;;  %v446_v37 = vld [vmem:[#allocation2 + $0xb0] sm:$0xff] }
 0x251   : > { %947 = vst [vmem:[#allocation2 + $0x50] sm:$0xff] %v883_v35  ;;  %979 = vst [vmem:[#allocation2 + $0x150] sm:$0xff] %v915_v36  ;;  %v478_v38 = vld [vmem:[#allocation2 + $0x1b0] sm:$0xff] }
 0x252   : > { %948 = vst [vmem:[#allocation2 + $0x58] sm:$0xff] %v884_v39  ;;  %980 = vst [vmem:[#allocation2 + $0x158] sm:$0xff] %v916_v40  ;;  %v718_v45 = vpop.f32.mrb[12].mxu0  ;;  %v814_v46 = vpop.f32.mrb[12].mxu1  ;;  %v447_v39 = vld [vmem:[#allocation2 + $0xb8] sm:$0xff] }
 0x253   : > { %v885_v47 = vadd.f32 %v718_v45, %v436_v41  ;;  %v917_v48 = vadd.f32 %v814_v46, %v468_v42  ;;  %v720_v49 = vpop.f32.mrb[13].mxu0  ;;  %v816_v50 = vpop.f32.mrb[13].mxu1  ;;  %v479_v40 = vld [vmem:[#allocation2 + $0x1b8] sm:$0xff] }
 0x254   : > { %v886_v51 = vadd.f32 %v720_v49, %v437_v43  ;;  %v918_v52 = vadd.f32 %v816_v50, %v469_v44  ;;  %v448_v49 = vld [vmem:[#allocation2 + $0xc0] sm:$0xff] }
 0x255   : > { %949 = vst [vmem:[#allocation2 + $0x60] sm:$0xff] %v885_v47  ;;  %981 = vst [vmem:[#allocation2 + $0x160] sm:$0xff] %v917_v48  ;;  %v480_v50 = vld [vmem:[#allocation2 + $0x1c0] sm:$0xff] }
 0x256   : > { %950 = vst [vmem:[#allocation2 + $0x68] sm:$0xff] %v886_v51  ;;  %982 = vst [vmem:[#allocation2 + $0x168] sm:$0xff] %v918_v52  ;;  %v724_v57 = vpop.f32.mrb[14].mxu0  ;;  %v820_v58 = vpop.f32.mrb[14].mxu1  ;;  %v449_v51 = vld [vmem:[#allocation2 + $0xc8] sm:$0xff] }
 0x257   : > { %v887_v59 = vadd.f32 %v724_v57, %v438_v53  ;;  %v919_v60 = vadd.f32 %v820_v58, %v470_v54  ;;  %v726_v61 = vpop.f32.mrb[15].mxu0  ;;  %v822_v62 = vpop.f32.mrb[15].mxu1  ;;  %v481_v52 = vld [vmem:[#allocation2 + $0x1c8] sm:$0xff] }
 0x258   : > { %v888_v63 = vadd.f32 %v726_v61, %v439_v55  ;;  %v920_v0 = vadd.f32 %v822_v62, %v471_v56  ;;  %v450_v61 = vld [vmem:[#allocation2 + $0xd0] sm:$0xff] }
 0x259   : > { %951 = vst [vmem:[#allocation2 + $0x70] sm:$0xff] %v887_v59  ;;  %983 = vst [vmem:[#allocation2 + $0x170] sm:$0xff] %v919_v60  ;;  %v482_v62 = vld [vmem:[#allocation2 + $0x1d0] sm:$0xff] }
 0x25a   : > { %952 = vst [vmem:[#allocation2 + $0x78] sm:$0xff] %v888_v63  ;;  %984 = vst [vmem:[#allocation2 + $0x178] sm:$0xff] %v920_v0  ;;  %v730_v5 = vpop.f32.mrb[16].mxu0  ;;  %v826_v6 = vpop.f32.mrb[16].mxu1  ;;  %v451_v63 = vld [vmem:[#allocation2 + $0xd8] sm:$0xff] }
 0x25b   : > { %v889_v7 = vadd.f32 %v730_v5, %v440_v1  ;;  %v921_v8 = vadd.f32 %v826_v6, %v472_v2  ;;  %v732_v9 = vpop.f32.mrb[17].mxu0  ;;  %v828_v10 = vpop.f32.mrb[17].mxu1  ;;  %v483_v0 = vld [vmem:[#allocation2 + $0x1d8] sm:$0xff] }
 0x25c   : > { %v890_v11 = vadd.f32 %v732_v9, %v441_v3  ;;  %v922_v12 = vadd.f32 %v828_v10, %v473_v4  ;;  %v452_v9 = vld [vmem:[#allocation2 + $0xe0] sm:$0xff] }
 0x25d   : > { %953 = vst [vmem:[#allocation2 + $0x80] sm:$0xff] %v889_v7  ;;  %985 = vst [vmem:[#allocation2 + $0x180] sm:$0xff] %v921_v8  ;;  %v484_v10 = vld [vmem:[#allocation2 + $0x1e0] sm:$0xff] }
 0x25e   : > { %954 = vst [vmem:[#allocation2 + $0x88] sm:$0xff] %v890_v11  ;;  %986 = vst [vmem:[#allocation2 + $0x188] sm:$0xff] %v922_v12  ;;  %v736_v17 = vpop.f32.mrb[18].mxu0  ;;  %v832_v18 = vpop.f32.mrb[18].mxu1  ;;  %v453_v11 = vld [vmem:[#allocation2 + $0xe8] sm:$0xff] }
 0x25f   : > { %v891_v19 = vadd.f32 %v736_v17, %v442_v13  ;;  %v923_v20 = vadd.f32 %v832_v18, %v474_v14  ;;  %v738_v21 = vpop.f32.mrb[19].mxu0  ;;  %v834_v22 = vpop.f32.mrb[19].mxu1  ;;  %v485_v12 = vld [vmem:[#allocation2 + $0x1e8] sm:$0xff] }
 0x260   : > { %v892_v23 = vadd.f32 %v738_v21, %v443_v15  ;;  %v924_v24 = vadd.f32 %v834_v22, %v475_v16  ;;  %v454_v21 = vld [vmem:[#allocation2 + $0xf0] sm:$0xff] }
 0x261   : > { %955 = vst [vmem:[#allocation2 + $0x90] sm:$0xff] %v891_v19  ;;  %987 = vst [vmem:[#allocation2 + $0x190] sm:$0xff] %v923_v20  ;;  %v486_v22 = vld [vmem:[#allocation2 + $0x1f0] sm:$0xff] }
 0x262   : > { %956 = vst [vmem:[#allocation2 + $0x98] sm:$0xff] %v892_v23  ;;  %988 = vst [vmem:[#allocation2 + $0x198] sm:$0xff] %v924_v24  ;;  %v742_v29 = vpop.f32.mrb[20].mxu0  ;;  %v838_v30 = vpop.f32.mrb[20].mxu1  ;;  %v455_v23 = vld [vmem:[#allocation2 + $0xf8] sm:$0xff] }
 0x263   : > { %v893_v31 = vadd.f32 %v742_v29, %v444_v25  ;;  %v925_v32 = vadd.f32 %v838_v30, %v476_v26  ;;  %v744_v33 = vpop.f32.mrb[21].mxu0  ;;  %v840_v34 = vpop.f32.mrb[21].mxu1  ;;  %v487_v24 = vld [vmem:[#allocation2 + $0x1f8] sm:$0xff] }
 0x264   : > { %v894_v35 = vadd.f32 %v744_v33, %v445_v27  ;;  %v926_v36 = vadd.f32 %v840_v34, %v477_v28  ;;  %v1071_v33 = vlaneseq (!%p1726_p10) }
 0x265   : > { %957 = vst [vmem:[#allocation2 + $0xa0] sm:$0xff] %v893_v31  ;;  %989 = vst [vmem:[#allocation2 + $0x1a0] sm:$0xff] %v925_v32 }
 0x266   : > { %958 = vst [vmem:[#allocation2 + $0xa8] sm:$0xff] %v894_v35  ;;  %990 = vst [vmem:[#allocation2 + $0x1a8] sm:$0xff] %v926_v36  ;;  %v748_v41 = vpop.f32.mrb[22].mxu0  ;;  %v844_v42 = vpop.f32.mrb[22].mxu1  ;;  %v1072_v34 = vshrl.u32 (!%p1726_p10), %v1071_v33, 7  ;;  %v1005_v36 = vld [vmem:[#allocation2] sm:$0xff] (!%p1726_p10) }
 0x267   : > { %v895_v43 = vadd.f32 %v748_v41, %v446_v37  ;;  %v927_v44 = vadd.f32 %v844_v42, %v478_v38  ;;  %v750_v45 = vpop.f32.mrb[23].mxu0  ;;  %v846_v46 = vpop.f32.mrb[23].mxu1  ;;  %v1069_v35 = vld [vmem:[%s350_s25] sm:$0x3] (!%p1726_p10)  ;;  %v1006_v38 = vld [vmem:[#allocation2 + $0x8] sm:$0xff] (!%p1726_p10)  ;;  %v1008_v41 = vld [vmem:[#allocation2 + $0x18] sm:$0xff] (!%p1726_p10) }
 0x268   : > { %v896_v47 = vadd.f32 %v750_v45, %v447_v39  ;;  %v928_v48 = vadd.f32 %v846_v46, %v479_v40  ;;  %v1073_v37 = vsub.s32 (!%p1726_p10), 0, %v1072_v34  ;;  %v1077_v39 = vsub.s32 (!%p1726_p10), 1, %v1072_v34  ;;  %v1007_v40 = vld [vmem:[#allocation2 + $0x10] sm:$0xff] (!%p1726_p10)  ;;  %v1009_v42 = vld [vmem:[#allocation2 + $0x20] sm:$0xff] (!%p1726_p10)  ;;  %v1010_v45 = vld [vmem:[#allocation2 + $0x28] sm:$0xff] (!%p1726_p10) }
 0x269   : > { %959 = vst [vmem:[#allocation2 + $0xb0] sm:$0xff] %v895_v43  ;;  %991 = vst [vmem:[#allocation2 + $0x1b0] sm:$0xff] %v927_v44  ;;  %v1011_v46 = vld [vmem:[#allocation2 + $0x30] sm:$0xff] (!%p1726_p10)  ;;  %v1017_v34 = vld [vmem:[#allocation2 + $0x60] sm:$0xff] (!%p1726_p10) }
 0x26a   : > { %960 = vst [vmem:[#allocation2 + $0xb8] sm:$0xff] %v896_v47  ;;  %992 = vst [vmem:[#allocation2 + $0x1b8] sm:$0xff] %v928_v48  ;;  %v754_v53 = vpop.f32.mrb[24].mxu0  ;;  %v850_v54 = vpop.f32.mrb[24].mxu1  ;;  %v2877_v43 = vrot.slane (!%p1726_p10), %v1069_v35, %v1073_v37  ;;  %v2879_v44 = vrot.slane (!%p1726_p10), %v1069_v35, %v1077_v39  ;;  %v1012_v47 = vld [vmem:[#allocation2 + $0x38] sm:$0xff] (!%p1726_p10)  ;;  %v1347_v33 = vld [vmem:[%s2659_s8 + $0x50] sm:$0xff] (!%p1726_p10) }
 0x26b   : > { %v897_v55 = vadd.f32 %v754_v53, %v448_v49  ;;  %v929_v56 = vadd.f32 %v850_v54, %v480_v50  ;;  %v756_v57 = vpop.f32.mrb[25].mxu0  ;;  %v852_v58 = vpop.f32.mrb[25].mxu1  ;;  %v1337_v49 = vld [vmem:[%s2659_s8] sm:$0xff] (!%p1726_p10)  ;;  %v1338_v53 = vld [vmem:[%s2659_s8 + $0x8] sm:$0xff] (!%p1726_p10)  ;;  %v1339_v54 = vld [vmem:[%s2659_s8 + $0x10] sm:$0xff] (!%p1726_p10) }
 0x26c   : > { %v898_v59 = vadd.f32 %v756_v57, %v449_v51  ;;  %v930_v60 = vadd.f32 %v852_v58, %v481_v52  ;;  %v1081_v48 = vadd.f32 (!%p1726_p10), %v2877_v43, %v1005_v36  ;;  %v1082_v50 = vadd.f32 (!%p1726_p10), %v2879_v44, %v1006_v38  ;;  %v1018_v35 = vld [vmem:[#allocation2 + $0x68] sm:$0xff] (!%p1726_p10)  ;;  %v1348_v39 = vld [vmem:[%s2659_s8 + $0x58] sm:$0xff] (!%p1726_p10) }
 0x26d   : > { %961 = vst [vmem:[#allocation2 + $0xc0] sm:$0xff] %v897_v55  ;;  %993 = vst [vmem:[#allocation2 + $0x1c0] sm:$0xff] %v929_v56  ;;  %v1083_v51 = vadd.f32 (!%p1726_p10), %v2877_v43, %v1007_v40  ;;  %v1084_v52 = vadd.f32 (!%p1726_p10), %v2879_v44, %v1008_v41  ;;  %v1340_v55 = vld [vmem:[%s2659_s8 + $0x18] sm:$0xff] (!%p1726_p10)  ;;  %v1085_v56 = vadd.f32 (!%p1726_p10), %v2877_v43, %v1009_v42 }
 0x26e   : > { %962 = vst [vmem:[#allocation2 + $0xc8] sm:$0xff] %v898_v59  ;;  %994 = vst [vmem:[#allocation2 + $0x1c8] sm:$0xff] %v930_v60  ;;  %v760_v1 = vpop.f32.mrb[26].mxu0  ;;  %v856_v2 = vpop.f32.mrb[26].mxu1  ;;  %v1086_v57 = vadd.f32 (!%p1726_p10), %v2879_v44, %v1010_v45  ;;  %v1087_v58 = vadd.f32 (!%p1726_p10), %v2877_v43, %v1011_v46  ;;  %v1088_v59 = vadd.f32 (!%p1726_p10), %v2879_v44, %v1012_v47  ;;  %vm1145_vm0 = vcmp.ge.f32.partialorder (!%p1726_p10), %v1081_v48, 0.0 }
 0x26f   : > { %v899_v3 = vadd.f32 %v760_v1, %v450_v61  ;;  %v931_v4 = vadd.f32 %v856_v2, %v482_v62  ;;  %v762_v5 = vpop.f32.mrb[27].mxu0  ;;  %v858_v6 = vpop.f32.mrb[27].mxu1  ;;  %v1209_v60 = vmul.f32 (!%p1726_p10), 0.2, %v1081_v48  ;;  %vm1146_vm1 = vcmp.ge.f32.partialorder (!%p1726_p10), %v1082_v50, 0.0 }
 0x270   : > { %v900_v7 = vadd.f32 %v762_v5, %v451_v63  ;;  %v932_v8 = vadd.f32 %v858_v6, %v483_v0  ;;  %v1210_v61 = vmul.f32 (!%p1726_p10), 0.2, %v1082_v50  ;;  %vm1147_vm2 = vcmp.ge.f32.partialorder (!%p1726_p10), %v1083_v51, 0.0 }
 0x271   : > { %963 = vst [vmem:[#allocation2 + $0xd0] sm:$0xff] %v899_v3  ;;  %995 = vst [vmem:[#allocation2 + $0x1d0] sm:$0xff] %v931_v4  ;;  %v1211_v62 = vmul.f32 (!%p1726_p10), 0.2, %v1083_v51  ;;  %vm1148_vm3 = vcmp.ge.f32.partialorder (!%p1726_p10), %v1084_v52, 0.0  ;;  %v1273_v0 = vsel (!%p1726_p10), %vm1145_vm0, %v1081_v48, %v1209_v60  ;;  %vm1149_vm4 = vcmp.ge.f32.partialorder (!%p1726_p10), %v1085_v56, 0.0 }
 0x272   : > { %964 = vst [vmem:[#allocation2 + $0xd8] sm:$0xff] %v900_v7  ;;  %996 = vst [vmem:[#allocation2 + $0x1d8] sm:$0xff] %v932_v8  ;;  %v766_v13 = vpop.f32.mrb[28].mxu0  ;;  %v862_v14 = vpop.f32.mrb[28].mxu1  ;;  %v1212_v63 = vmul.f32 (!%p1726_p10), 0.2, %v1084_v52  ;;  %v1274_v1 = vsel (!%p1726_p10), %vm1146_vm1, %v1082_v50, %v1210_v61  ;;  %v1401_v4 = vmul.f32 (!%p1726_p10), %v1337_v49, %v1273_v0  ;;  %v1093_v46 = vadd.f32 (!%p1726_p10), %v2877_v43, %v1017_v34 }
 0x273   : > { %v901_v15 = vadd.f32 %v766_v13, %v452_v9  ;;  %v933_v16 = vadd.f32 %v862_v14, %v484_v10  ;;  %v768_v17 = vpop.f32.mrb[29].mxu0  ;;  %v864_v18 = vpop.f32.mrb[29].mxu1  ;;  %v1213_v2 = vmul.f32 (!%p1726_p10), 0.2, %v1085_v56  ;;  %v1341_v3 = vld [vmem:[%s2659_s8 + $0x20] sm:$0xff] (!%p1726_p10)  ;;  %v1402_v5 = vmul.f32 (!%p1726_p10), %v1338_v53, %v1274_v1  ;;  %v1014_v9 = vld [vmem:[#allocation2 + $0x48] sm:$0xff] (!%p1726_p10) }
 0x274   : > { %v902_v19 = vadd.f32 %v768_v17, %v453_v11  ;;  %v934_v20 = vadd.f32 %v864_v18, %v485_v12  ;;  %1004 = sbr.rel (%p1726_p10) target bundleno = 708 (0x2c4), region = 56  ;;  %v1275_v6 = vsel (!%p1726_p10), %vm1147_vm2, %v1083_v51, %v1211_v62  ;;  %v1276_v7 = vsel (!%p1726_p10), %vm1148_vm3, %v1084_v52, %v1212_v63  ;;  %v1013_v8 = vld [vmem:[#allocation2 + $0x40] sm:$0xff] (!%p1726_p10)  ;;  %v1342_v13 = vld [vmem:[%s2659_s8 + $0x28] sm:$0xff] (!%p1726_p10)  ;;  %v1015_v14 = vld [vmem:[#allocation2 + $0x50] sm:$0xff] (!%p1726_p10)  ;;  %1465 = vst [vmem:[%s2676_s11] sm:$0xff] (!%p1726_p10), %v1401_v4 }
 0x275   : > { %965 = vst [vmem:[#allocation2 + $0xe0] sm:$0xff] %v901_v15  ;;  %997 = vst [vmem:[#allocation2 + $0x1e0] sm:$0xff] %v933_v16  ;;  %v1403_v10 = vmul.f32 (!%p1726_p10), %v1339_v54, %v1275_v6  ;;  %v1404_v11 = vmul.f32 (!%p1726_p10), %v1340_v55, %v1276_v7  ;;  %v1277_v12 = vsel (!%p1726_p10), %vm1149_vm4, %v1085_v56, %v1213_v2  ;;  %vm1150_vm5 = vcmp.ge.f32.partialorder (!%p1726_p10), %v1086_v57, 0.0  ;;  %v1016_v15 = vld [vmem:[#allocation2 + $0x58] sm:$0xff] (!%p1726_p10)  ;;  %v1019_v48 = vld [vmem:[#allocation2 + $0x70] sm:$0xff] (!%p1726_p10) }
 0x276   : > { %966 = vst [vmem:[#allocation2 + $0xe8] sm:$0xff] %v902_v19  ;;  %998 = vst [vmem:[#allocation2 + $0x1e8] sm:$0xff] %v934_v20  ;;  %v772_v25 = vpop.f32.mrb[30].mxu0  ;;  %v868_v26 = vpop.f32.mrb[30].mxu1  ;;  %v1405_v16 = vmul.f32 (!%p1726_p10), %v1341_v3, %v1277_v12  ;;  %v1214_v17 = vmul.f32 (!%p1726_p10), 0.2, %v1086_v57  ;;  %v1094_v47 = vadd.f32 (!%p1726_p10), %v2879_v44, %v1018_v35  ;;  %v1095_v63 = vadd.f32 (!%p1726_p10), %v2877_v43, %v1019_v48 }
 0x277   : > { %v903_v27 = vadd.f32 %v772_v25, %v454_v21  ;;  %v935_v28 = vadd.f32 %v868_v26, %v486_v22  ;;  %v774_v29 = vpop.f32.mrb[31].mxu0  ;;  %v870_v30 = vpop.f32.mrb[31].mxu1  ;;  %1466 = vst [vmem:[%s2676_s11 + $0x8] sm:$0xff] (!%p1726_p10), %v1402_v5  ;;  %vm1151_vm6 = vcmp.ge.f32.partialorder (!%p1726_p10), %v1087_v58, 0.0  ;;  %v1215_v18 = vmul.f32 (!%p1726_p10), 0.2, %v1087_v58 }
 0x278   : > { %v904_v31 = vadd.f32 %v774_v29, %v455_v23  ;;  %v936_v32 = vadd.f32 %v870_v30, %v487_v24  ;;  %v1343_v19 = vld [vmem:[%s2659_s8 + $0x30] sm:$0xff] (!%p1726_p10)  ;;  %1467 = vst [vmem:[%s2676_s11 + $0x10] sm:$0xff] (!%p1726_p10), %v1403_v10  ;;  %1468 = vst [vmem:[%s2676_s11 + $0x18] sm:$0xff] (!%p1726_p10), %v1404_v11  ;;  %vm1152_vm7 = vcmp.ge.f32.partialorder (!%p1726_p10), %v1088_v59, 0.0  ;;  %v1216_v20 = vmul.f32 (!%p1726_p10), 0.2, %v1088_v59 }
 0x279   : > { %967 = vst [vmem:[#allocation2 + $0xf0] sm:$0xff] %v903_v27  ;;  %999 = vst [vmem:[#allocation2 + $0x1f0] sm:$0xff] %v935_v28  ;;  %v1344_v21 = vld [vmem:[%s2659_s8 + $0x38] sm:$0xff] (!%p1726_p10)  ;;  %v1089_v22 = vadd.f32 (!%p1726_p10), %v2877_v43, %v1013_v8  ;;  %v1090_v23 = vadd.f32 (!%p1726_p10), %v2879_v44, %v1014_v9  ;;  %v1278_v24 = vsel (!%p1726_p10), %vm1150_vm5, %v1086_v57, %v1214_v17  ;;  %v1345_v26 = vld [vmem:[%s2659_s8 + $0x40] sm:$0xff] (!%p1726_p10)  ;;  %vm1157_vm12 = vcmp.ge.f32.partialorder (!%p1726_p10), %v1093_v46, 0.0 }
 0x27a   : > { %968 = vst [vmem:[#allocation2 + $0xf8] sm:$0xff] %v904_v31  ;;  %1000 = vst [vmem:[#allocation2 + $0x1f8] sm:$0xff] %v936_v32  ;;  %v1279_v25 = vsel (!%p1726_p10), %vm1151_vm6, %v1087_v58, %v1215_v18  ;;  %v1346_v27 = vld [vmem:[%s2659_s8 + $0x48] sm:$0xff] (!%p1726_p10)  ;;  %v1091_v28 = vadd.f32 (!%p1726_p10), %v2877_v43, %v1015_v14  ;;  %v1092_v29 = vadd.f32 (!%p1726_p10), %v2879_v44, %v1016_v15  ;;  %v1020_v49 = vld [vmem:[#allocation2 + $0x78] sm:$0xff] (!%p1726_p10)  ;;  %vm1158_vm13 = vcmp.ge.f32.partialorder (!%p1726_p10), %v1094_v47, 0.0 }
 0x27b   : > { %1469 = vst [vmem:[%s2676_s11 + $0x20] sm:$0xff] %v1405_v16  ;;  %v1406_v30 = vmul.f32 %v1342_v13, %v1278_v24  ;;  %v1407_v31 = vmul.f32 %v1343_v19, %v1279_v25  ;;  %v1280_v32 = vsel %vm1152_vm7, %v1088_v59, %v1216_v20  ;;  %vm1153_vm8 = vcmp.ge.f32.partialorder %v1089_v22, 0.0  ;;  %v1021_v54 = vld [vmem:[#allocation2 + $0x80] sm:$0xff]  ;;  %v1022_v55 = vld [vmem:[#allocation2 + $0x88] sm:$0xff]  ;;  %v1023_v56 = vld [vmem:[#allocation2 + $0x90] sm:$0xff] }
 0x27c   : > { %v1408_v36 = vmul.f32 %v1344_v21, %v1280_v32  ;;  %v1217_v37 = vmul.f32 0.2, %v1089_v22  ;;  %vm1154_vm9 = vcmp.ge.f32.partialorder %v1090_v23, 0.0  ;;  %v1218_v38 = vmul.f32 0.2, %v1090_v23  ;;  %v1349_v60 = vld [vmem:[%s2659_s8 + $0x60] sm:$0xff] }
 0x27d   : > { %1470 = vst [vmem:[%s2676_s11 + $0x28] sm:$0xff] %v1406_v30  ;;  %1471 = vst [vmem:[%s2676_s11 + $0x30] sm:$0xff] %v1407_v31  ;;  %vm1155_vm10 = vcmp.ge.f32.partialorder %v1091_v28, 0.0  ;;  %v1219_v40 = vmul.f32 0.2, %v1091_v28  ;;  %vm1156_vm11 = vcmp.ge.f32.partialorder %v1092_v29, 0.0  ;;  %v1096_v0 = vadd.f32 %v2879_v44, %v1020_v49 }
 0x27e   : > { %v1220_v41 = vmul.f32 0.2, %v1092_v29  ;;  %1472 = vst [vmem:[%s2676_s11 + $0x38] sm:$0xff] %v1408_v36  ;;  %v1281_v42 = vsel %vm1153_vm8, %v1089_v22, %v1217_v37  ;;  %v1282_v45 = vsel %vm1154_vm9, %v1090_v23, %v1218_v38  ;;  %v1221_v59 = vmul.f32 0.2, %v1093_v46  ;;  %v1350_v62 = vld [vmem:[%s2659_s8 + $0x68] sm:$0xff] }
 0x27f   : > { %v1409_v50 = vmul.f32 %v1345_v26, %v1281_v42  ;;  %v1410_v51 = vmul.f32 %v1346_v27, %v1282_v45  ;;  %v1283_v52 = vsel %vm1155_vm10, %v1091_v28, %v1219_v40  ;;  %v1222_v61 = vmul.f32 0.2, %v1094_v47  ;;  %v1351_v8 = vld [vmem:[%s2659_s8 + $0x70] sm:$0xff]  ;;  %v1352_v9 = vld [vmem:[%s2659_s8 + $0x78] sm:$0xff]  ;;  %v1353_v10 = vld [vmem:[%s2659_s8 + $0x80] sm:$0xff] }
 0x280   : > { %v1284_v53 = vsel %vm1156_vm11, %v1092_v29, %v1220_v41  ;;  %v1411_v57 = vmul.f32 %v1347_v33, %v1283_v52  ;;  %v1285_v1 = vsel %vm1157_vm12, %v1093_v46, %v1221_v59  ;;  %v1097_v2 = vadd.f32 %v2877_v43, %v1021_v54  ;;  %v1354_v13 = vld [vmem:[%s2659_s8 + $0x88] sm:$0xff]  ;;  %v1024_v14 = vld [vmem:[#allocation2 + $0x98] sm:$0xff]  ;;  %v1025_v18 = vld [vmem:[#allocation2 + $0xa0] sm:$0xff] }
 0x281   : > { %v1412_v58 = vmul.f32 %v1348_v39, %v1284_v53  ;;  %1473 = vst [vmem:[%s2676_s11 + $0x40] sm:$0xff] %v1409_v50  ;;  %1474 = vst [vmem:[%s2676_s11 + $0x48] sm:$0xff] %v1410_v51  ;;  %v1098_v3 = vadd.f32 %v2879_v44, %v1022_v55  ;;  %v1099_v4 = vadd.f32 %v2877_v43, %v1023_v56  ;;  %vm1159_vm14 = vcmp.ge.f32.partialorder %v1095_v63, 0.0  ;;  %v1355_v22 = vld [vmem:[%s2659_s8 + $0x90] sm:$0xff]  ;;  %v1026_v23 = vld [vmem:[#allocation2 + $0xa8] sm:$0xff] }
 0x282   : > { %1475 = vst [vmem:[%s2676_s11 + $0x50] sm:$0xff] %v1411_v57  ;;  %v1413_v5 = vmul.f32 %v1349_v60, %v1285_v1  ;;  %v1286_v6 = vsel %vm1158_vm13, %v1094_v47, %v1222_v61  ;;  %v1223_v7 = vmul.f32 0.2, %v1095_v63  ;;  %vm1160_vm15 = vcmp.ge.f32.partialorder %v1096_v0, 0.0  ;;  %v1027_v28 = vld [vmem:[#allocation2 + $0xb0] sm:$0xff]  ;;  %v1028_v29 = vld [vmem:[#allocation2 + $0xb8] sm:$0xff] }
 0x283   : > { %1476 = vst [vmem:[%s2676_s11 + $0x58] sm:$0xff] %v1412_v58  ;;  %v1414_v11 = vmul.f32 %v1350_v62, %v1286_v6  ;;  %v1224_v12 = vmul.f32 0.2, %v1096_v0  ;;  %vm1161_vm0 = vcmp.ge.f32.partialorder %v1097_v2, 0.0  ;;  %v1225_v16 = vmul.f32 0.2, %v1097_v2 }
 0x284   : > { %1477 = vst [vmem:[%s2676_s11 + $0x60] sm:$0xff] %v1413_v5  ;;  %v1287_v15 = vsel %vm1159_vm14, %v1095_v63, %v1223_v7  ;;  %vm1162_vm1 = vcmp.ge.f32.partialorder %v1098_v3, 0.0  ;;  %v1226_v17 = vmul.f32 0.2, %v1098_v3  ;;  %vm1163_vm2 = vcmp.ge.f32.partialorder %v1099_v4, 0.0  ;;  %v1029_v34 = vld [vmem:[#allocation2 + $0xc0] sm:$0xff] }
 0x285   : > { %1478 = vst [vmem:[%s2676_s11 + $0x68] sm:$0xff] %v1414_v11  ;;  %v1415_v19 = vmul.f32 %v1351_v8, %v1287_v15  ;;  %v1288_v20 = vsel %vm1160_vm15, %v1096_v0, %v1224_v12  ;;  %v1227_v21 = vmul.f32 0.2, %v1099_v4  ;;  %v1289_v25 = vsel %vm1161_vm0, %v1097_v2, %v1225_v16  ;;  %v1356_v37 = vld [vmem:[%s2659_s8 + $0x98] sm:$0xff]  ;;  %v1357_v40 = vld [vmem:[%s2659_s8 + $0xa0] sm:$0xff]  ;;  %v1358_v47 = vld [vmem:[%s2659_s8 + $0xa8] sm:$0xff] }
 0x286   : > { %v1416_v24 = vmul.f32 %v1352_v9, %v1288_v20  ;;  %v1290_v26 = vsel %vm1162_vm1, %v1098_v3, %v1226_v17  ;;  %v1100_v27 = vadd.f32 %v2879_v44, %v1024_v14  ;;  %v1417_v30 = vmul.f32 %v1353_v10, %v1289_v25  ;;  %v1359_v52 = vld [vmem:[%s2659_s8 + $0xb0] sm:$0xff]  ;;  %v1030_v53 = vld [vmem:[#allocation2 + $0xc8] sm:$0xff]  ;;  %v1360_v58 = vld [vmem:[%s2659_s8 + $0xb8] sm:$0xff] }
 0x287   : > { %1479 = vst [vmem:[%s2676_s11 + $0x70] sm:$0xff] %v1415_v19  ;;  %v1418_v31 = vmul.f32 %v1354_v13, %v1290_v26  ;;  %v1291_v32 = vsel %vm1163_vm2, %v1099_v4, %v1227_v21  ;;  %v1101_v33 = vadd.f32 %v2877_v43, %v1025_v18  ;;  %v1102_v38 = vadd.f32 %v2879_v44, %v1026_v23  ;;  %v1031_v54 = vld [vmem:[#allocation2 + $0xd0] sm:$0xff]  ;;  %v1032_v59 = vld [vmem:[#allocation2 + $0xd8] sm:$0xff]  ;;  %v1033_v60 = vld [vmem:[#allocation2 + $0xe0] sm:$0xff] }
 0x288   : > { %1480 = vst [vmem:[%s2676_s11 + $0x78] sm:$0xff] %v1416_v24  ;;  %v1419_v35 = vmul.f32 %v1355_v22, %v1291_v32  ;;  %vm1164_vm3 = vcmp.ge.f32.partialorder %v1100_v27, 0.0  ;;  %v1228_v36 = vmul.f32 0.2, %v1100_v27  ;;  %1481 = vst [vmem:[%s2676_s11 + $0x80] sm:$0xff] %v1417_v30  ;;  %v1103_v41 = vadd.f32 %v2877_v43, %v1027_v28  ;;  %v1361_v0 = vld [vmem:[%s2659_s8 + $0xc0] sm:$0xff] }
 0x289   : > { %1482 = vst [vmem:[%s2676_s11 + $0x88] sm:$0xff] %v1418_v31  ;;  %vm1165_vm4 = vcmp.ge.f32.partialorder %v1101_v33, 0.0  ;;  %v1229_v39 = vmul.f32 0.2, %v1101_v33  ;;  %v1104_v42 = vadd.f32 %v2879_v44, %v1028_v29  ;;  %vm1166_vm5 = vcmp.ge.f32.partialorder %v1102_v38, 0.0  ;;  %v1362_v4 = vld [vmem:[%s2659_s8 + $0xc8] sm:$0xff] }
 0x28a   : > { %1483 = vst [vmem:[%s2676_s11 + $0x90] sm:$0xff] %v1419_v35  ;;  %v1292_v45 = vsel %vm1164_vm3, %v1100_v27, %v1228_v36  ;;  %v1230_v46 = vmul.f32 0.2, %v1102_v38  ;;  %v1105_v48 = vadd.f32 %v2877_v43, %v1029_v34  ;;  %vm1167_vm6 = vcmp.ge.f32.partialorder %v1103_v41, 0.0  ;;  %v1363_v8 = vld [vmem:[%s2659_s8 + $0xd0] sm:$0xff]  ;;  %v1034_v11 = vld [vmem:[#allocation2 + $0xe8] sm:$0xff] }
 0x28b   : > { %v1420_v49 = vmul.f32 %v1356_v37, %v1292_v45  ;;  %v1293_v50 = vsel %vm1165_vm4, %v1101_v33, %v1229_v39  ;;  %v1231_v51 = vmul.f32 0.2, %v1103_v41  ;;  %vm1168_vm7 = vcmp.ge.f32.partialorder %v1104_v42, 0.0  ;;  %v1035_v12 = vld [vmem:[#allocation2 + $0xf0] sm:$0xff]  ;;  %v1364_v15 = vld [vmem:[%s2659_s8 + $0xd8] sm:$0xff]  ;;  %v1365_v21 = vld [vmem:[%s2659_s8 + $0xe0] sm:$0xff] }
 0x28c   : > { %v1421_v55 = vmul.f32 %v1357_v40, %v1293_v50  ;;  %v1294_v56 = vsel %vm1166_vm5, %v1102_v38, %v1230_v46  ;;  %v1232_v57 = vmul.f32 0.2, %v1104_v42  ;;  %vm1169_vm8 = vcmp.ge.f32.partialorder %v1105_v48, 0.0  ;;  %v1036_v16 = vld [vmem:[#allocation2 + $0xf8] sm:$0xff]  ;;  %v1037_v28 = vld [vmem:[#allocation2 + $0x100] sm:$0xff]  ;;  %v1038_v29 = vld [vmem:[#allocation2 + $0x108] sm:$0xff] }
 0x28d   : > { %1484 = vst [vmem:[%s2676_s11 + $0x98] sm:$0xff] %v1420_v49  ;;  %v1422_v61 = vmul.f32 %v1358_v47, %v1294_v56  ;;  %v1295_v62 = vsel %vm1167_vm6, %v1103_v41, %v1231_v51  ;;  %v1233_v63 = vmul.f32 0.2, %v1105_v48  ;;  %v1106_v3 = vadd.f32 %v2879_v44, %v1030_v53  ;;  %v1366_v33 = vld [vmem:[%s2659_s8 + $0xe8] sm:$0xff]  ;;  %v1039_v34 = vld [vmem:[#allocation2 + $0x110] sm:$0xff]  ;;  %v1040_v35 = vld [vmem:[#allocation2 + $0x118] sm:$0xff] }
 0x28e   : > { %1485 = vst [vmem:[%s2676_s11 + $0xa0] sm:$0xff] %v1421_v55  ;;  %v1423_v1 = vmul.f32 %v1359_v52, %v1295_v62  ;;  %v1296_v2 = vsel %vm1168_vm7, %v1104_v42, %v1232_v57  ;;  %v1107_v5 = vadd.f32 %v2877_v43, %v1031_v54  ;;  %v1108_v9 = vadd.f32 %v2879_v44, %v1032_v59  ;;  %v1367_v39 = vld [vmem:[%s2659_s8 + $0xf0] sm:$0xff]  ;;  %v1368_v41 = vld [vmem:[%s2659_s8 + $0xf8] sm:$0xff]  ;;  %v1370_v49 = vld [vmem:[%s2659_s8 + $0x108] sm:$0xff] }
 0x28f   : > { %1486 = vst [vmem:[%s2676_s11 + $0xa8] sm:$0xff] %v1422_v61  ;;  %v1424_v6 = vmul.f32 %v1360_v58, %v1296_v2  ;;  %v1297_v7 = vsel %vm1169_vm8, %v1105_v48, %v1233_v63  ;;  %v1109_v10 = vadd.f32 %v2877_v43, %v1033_v60  ;;  %vm1170_vm9 = vcmp.ge.f32.partialorder %v1106_v3, 0.0  ;;  %v1369_v48 = vld [vmem:[%s2659_s8 + $0x100] sm:$0xff]  ;;  %v1371_v55 = vld [vmem:[%s2659_s8 + $0x110] sm:$0xff]  ;;  %v1042_v57 = vld [vmem:[#allocation2 + $0x128] sm:$0xff] }
 0x290   : > { %1487 = vst [vmem:[%s2676_s11 + $0xb0] sm:$0xff] %v1423_v1  ;;  %v1425_v13 = vmul.f32 %v1361_v0, %v1297_v7  ;;  %v1234_v14 = vmul.f32 0.2, %v1106_v3  ;;  %vm1171_vm10 = vcmp.ge.f32.partialorder %v1107_v5, 0.0  ;;  %v1235_v17 = vmul.f32 0.2, %v1107_v5 }
 0x291   : > { %1488 = vst [vmem:[%s2676_s11 + $0xb8] sm:$0xff] %v1424_v6  ;;  %vm1172_vm11 = vcmp.ge.f32.partialorder %v1108_v9, 0.0  ;;  %v1236_v18 = vmul.f32 0.2, %v1108_v9  ;;  %vm1173_vm12 = vcmp.ge.f32.partialorder %v1109_v10, 0.0  ;;  %v1110_v22 = vadd.f32 %v2879_v44, %v1034_v11  ;;  %v1041_v56 = vld [vmem:[#allocation2 + $0x120] sm:$0xff] }
 0x292   : > { %1489 = vst [vmem:[%s2676_s11 + $0xc0] sm:$0xff] %v1425_v13  ;;  %v1298_v19 = vsel %vm1170_vm9, %v1106_v3, %v1234_v14  ;;  %v1237_v20 = vmul.f32 0.2, %v1109_v10  ;;  %v1111_v23 = vadd.f32 %v2877_v43, %v1035_v12  ;;  %v1299_v25 = vsel %vm1171_vm10, %v1107_v5, %v1235_v17  ;;  %v1372_v61 = vld [vmem:[%s2659_s8 + $0x118] sm:$0xff]  ;;  %v1046_v11 = vld [vmem:[#allocation2 + $0x148] sm:$0xff]  ;;  %v1047_v12 = vld [vmem:[#allocation2 + $0x150] sm:$0xff] }
 0x293   : > { %v1426_v24 = vmul.f32 %v1362_v4, %v1298_v19  ;;  %v1300_v26 = vsel %vm1172_vm11, %v1108_v9, %v1236_v18  ;;  %v1112_v27 = vadd.f32 %v2879_v44, %v1036_v16  ;;  %v1427_v30 = vmul.f32 %v1363_v8, %v1299_v25  ;;  %v1043_v4 = vld [vmem:[#allocation2 + $0x130] sm:$0xff]  ;;  %v1044_v5 = vld [vmem:[#allocation2 + $0x138] sm:$0xff]  ;;  %v1373_v16 = vld [vmem:[%s2659_s8 + $0x120] sm:$0xff] }
 0x294   : > { %v1428_v31 = vmul.f32 %v1364_v15, %v1300_v26  ;;  %v1301_v32 = vsel %vm1173_vm12, %v1109_v10, %v1237_v20  ;;  %vm1174_vm13 = vcmp.ge.f32.partialorder %v1110_v22, 0.0  ;;  %v1238_v37 = vmul.f32 0.2, %v1110_v22  ;;  %v1045_v10 = vld [vmem:[#allocation2 + $0x140] sm:$0xff]  ;;  %v1374_v18 = vld [vmem:[%s2659_s8 + $0x128] sm:$0xff] }
 0x295   : > { %1490 = vst [vmem:[%s2676_s11 + $0xc8] sm:$0xff] %v1426_v24  ;;  %v1429_v36 = vmul.f32 %v1365_v21, %v1301_v32  ;;  %vm1175_vm14 = vcmp.ge.f32.partialorder %v1111_v23, 0.0  ;;  %v1239_v38 = vmul.f32 0.2, %v1111_v23  ;;  %1491 = vst [vmem:[%s2676_s11 + $0xd0] sm:$0xff] %v1427_v30  ;;  %vm1176_vm15 = vcmp.ge.f32.partialorder %v1112_v27, 0.0 }
 0x296   : > { %1492 = vst [vmem:[%s2676_s11 + $0xd8] sm:$0xff] %v1428_v31  ;;  %v1240_v40 = vmul.f32 0.2, %v1112_v27  ;;  %v1113_v42 = vadd.f32 %v2877_v43, %v1037_v28  ;;  %v1114_v45 = vadd.f32 %v2879_v44, %v1038_v29  ;;  %v1302_v46 = vsel %vm1174_vm13, %v1110_v22, %v1238_v37  ;;  %v1375_v28 = vld [vmem:[%s2659_s8 + $0x130] sm:$0xff]  ;;  %v1376_v29 = vld [vmem:[%s2659_s8 + $0x138] sm:$0xff]  ;;  %v1377_v30 = vld [vmem:[%s2659_s8 + $0x140] sm:$0xff] }
 0x297   : > { %1493 = vst [vmem:[%s2676_s11 + $0xe0] sm:$0xff] %v1429_v36  ;;  %v1303_v47 = vsel %vm1175_vm14, %v1111_v23, %v1239_v38  ;;  %v1115_v50 = vadd.f32 %v2877_v43, %v1039_v34  ;;  %v1116_v51 = vadd.f32 %v2879_v44, %v1040_v35  ;;  %v1430_v52 = vmul.f32 %v1366_v33, %v1302_v46  ;;  %v1378_v33 = vld [vmem:[%s2659_s8 + $0x148] sm:$0xff]  ;;  %v1048_v34 = vld [vmem:[#allocation2 + $0x158] sm:$0xff]  ;;  %v1049_v38 = vld [vmem:[#allocation2 + $0x160] sm:$0xff] }
 0x298   : > { %v1431_v53 = vmul.f32 %v1367_v39, %v1303_v47  ;;  %v1304_v54 = vsel %vm1176_vm15, %v1112_v27, %v1240_v40  ;;  %vm1177_vm0 = vcmp.ge.f32.partialorder %v1113_v42, 0.0  ;;  %v1241_v59 = vmul.f32 0.2, %v1113_v42 }
 0x299   : > { %v1432_v58 = vmul.f32 %v1368_v41, %v1304_v54  ;;  %vm1178_vm1 = vcmp.ge.f32.partialorder %v1114_v45, 0.0  ;;  %v1242_v60 = vmul.f32 0.2, %v1114_v45  ;;  %1494 = vst [vmem:[%s2676_s11 + $0xe8] sm:$0xff] %v1430_v52  ;;  %vm1179_vm2 = vcmp.ge.f32.partialorder %v1115_v50, 0.0 }
 0x29a   : > { %1495 = vst [vmem:[%s2676_s11 + $0xf0] sm:$0xff] %v1431_v53  ;;  %v1243_v62 = vmul.f32 0.2, %v1115_v50  ;;  %vm1180_vm3 = vcmp.ge.f32.partialorder %v1116_v51, 0.0  ;;  %v1244_v63 = vmul.f32 0.2, %v1116_v51  ;;  %v1305_v0 = vsel %vm1177_vm0, %v1113_v42, %v1241_v59 }
 0x29b   : > { %1496 = vst [vmem:[%s2676_s11 + $0xf8] sm:$0xff] %v1432_v58  ;;  %v1306_v1 = vsel %vm1178_vm1, %v1114_v45, %v1242_v60  ;;  %v1117_v2 = vadd.f32 %v2877_v43, %v1041_v56  ;;  %v1118_v3 = vadd.f32 %v2879_v44, %v1042_v57  ;;  %v1433_v6 = vmul.f32 %v1369_v48, %v1305_v0  ;;  %v1379_v42 = vld [vmem:[%s2659_s8 + $0x150] sm:$0xff]  ;;  %v1050_v45 = vld [vmem:[#allocation2 + $0x168] sm:$0xff]  ;;  %v1053_v56 = vld [vmem:[#allocation2 + $0x180] sm:$0xff] }
 0x29c   : > { %v1434_v7 = vmul.f32 %v1370_v49, %v1306_v1  ;;  %v1307_v8 = vsel %vm1179_vm2, %v1115_v50, %v1243_v62  ;;  %v1308_v9 = vsel %vm1180_vm3, %v1116_v51, %v1244_v63  ;;  %v1119_v19 = vadd.f32 %v2877_v43, %v1043_v4  ;;  %v1051_v50 = vld [vmem:[#allocation2 + $0x170] sm:$0xff]  ;;  %v1052_v51 = vld [vmem:[#allocation2 + $0x178] sm:$0xff]  ;;  %v1381_v62 = vld [vmem:[%s2659_s8 + $0x160] sm:$0xff] }
 0x29d   : > { %v1435_v13 = vmul.f32 %v1371_v55, %v1307_v8  ;;  %v1436_v14 = vmul.f32 %v1372_v61, %v1308_v9  ;;  %vm1181_vm4 = vcmp.ge.f32.partialorder %v1117_v2, 0.0  ;;  %v1245_v15 = vmul.f32 0.2, %v1117_v2  ;;  %1497 = vst [vmem:[%s2676_s11 + $0x100] sm:$0xff] %v1433_v6  ;;  %v1380_v59 = vld [vmem:[%s2659_s8 + $0x158] sm:$0xff]  ;;  %v1383_v8 = vld [vmem:[%s2659_s8 + $0x170] sm:$0xff] }
 0x29e   : > { %1498 = vst [vmem:[%s2676_s11 + $0x108] sm:$0xff] %v1434_v7  ;;  %vm1182_vm5 = vcmp.ge.f32.partialorder %v1118_v3, 0.0  ;;  %v1246_v17 = vmul.f32 0.2, %v1118_v3  ;;  %v1120_v20 = vadd.f32 %v2879_v44, %v1044_v5  ;;  %v1121_v22 = vadd.f32 %v2877_v43, %v1045_v10  ;;  %v1054_v9 = vld [vmem:[#allocation2 + $0x188] sm:$0xff]  ;;  %v1055_v10 = vld [vmem:[#allocation2 + $0x190] sm:$0xff] }
 0x29f   : > { %1499 = vst [vmem:[%s2676_s11 + $0x110] sm:$0xff] %v1435_v13  ;;  %1500 = vst [vmem:[%s2676_s11 + $0x118] sm:$0xff] %v1436_v14  ;;  %v1309_v21 = vsel %vm1181_vm4, %v1117_v2, %v1245_v15  ;;  %v1122_v23 = vadd.f32 %v2879_v44, %v1046_v11  ;;  %v1123_v24 = vadd.f32 %v2877_v43, %v1047_v12  ;;  %vm1183_vm6 = vcmp.ge.f32.partialorder %v1119_v19, 0.0  ;;  %v1384_v14 = vld [vmem:[%s2659_s8 + $0x178] sm:$0xff] }
 0x2a0   : > { %v1437_v25 = vmul.f32 %v1373_v16, %v1309_v21  ;;  %v1310_v26 = vsel %vm1182_vm5, %v1118_v3, %v1246_v17  ;;  %v1247_v27 = vmul.f32 0.2, %v1119_v19  ;;  %vm1184_vm7 = vcmp.ge.f32.partialorder %v1120_v20, 0.0  ;;  %v1382_v3 = vld [vmem:[%s2659_s8 + $0x168] sm:$0xff]  ;;  %v1056_v15 = vld [vmem:[#allocation2 + $0x198] sm:$0xff]  ;;  %v1057_v16 = vld [vmem:[#allocation2 + $0x1a0] sm:$0xff] }
 0x2a1   : > { %v1438_v31 = vmul.f32 %v1374_v18, %v1310_v26  ;;  %v1248_v32 = vmul.f32 0.2, %v1120_v20  ;;  %vm1185_vm8 = vcmp.ge.f32.partialorder %v1121_v22, 0.0  ;;  %v1249_v36 = vmul.f32 0.2, %v1121_v22 }
 0x2a2   : > { %1501 = vst [vmem:[%s2676_s11 + $0x120] sm:$0xff] %v1437_v25  ;;  %v1311_v35 = vsel %vm1183_vm6, %v1119_v19, %v1247_v27  ;;  %vm1186_vm9 = vcmp.ge.f32.partialorder %v1122_v23, 0.0  ;;  %v1250_v37 = vmul.f32 0.2, %v1122_v23  ;;  %vm1187_vm10 = vcmp.ge.f32.partialorder %v1123_v24, 0.0 }
 0x2a3   : > { %1502 = vst [vmem:[%s2676_s11 + $0x128] sm:$0xff] %v1438_v31  ;;  %v1439_v39 = vmul.f32 %v1375_v28, %v1311_v35  ;;  %v1312_v40 = vsel %vm1184_vm7, %v1120_v20, %v1248_v32  ;;  %v1251_v41 = vmul.f32 0.2, %v1123_v24  ;;  %v1313_v47 = vsel %vm1185_vm8, %v1121_v22, %v1249_v36  ;;  %v1385_v20 = vld [vmem:[%s2659_s8 + $0x180] sm:$0xff]  ;;  %v1387_v28 = vld [vmem:[%s2659_s8 + $0x190] sm:$0xff]  ;;  %v1058_v31 = vld [vmem:[#allocation2 + $0x1a8] sm:$0xff] }
 0x2a4   : > { %v1440_v46 = vmul.f32 %v1376_v29, %v1312_v40  ;;  %v1314_v48 = vsel %vm1186_vm9, %v1122_v23, %v1250_v37  ;;  %v1124_v49 = vadd.f32 %v2879_v44, %v1048_v34  ;;  %v1441_v52 = vmul.f32 %v1377_v30, %v1313_v47  ;;  %v1059_v32 = vld [vmem:[#allocation2 + $0x1b0] sm:$0xff]  ;;  %v1388_v35 = vld [vmem:[%s2659_s8 + $0x198] sm:$0xff] }
 0x2a5   : > { %1503 = vst [vmem:[%s2676_s11 + $0x130] sm:$0xff] %v1439_v39  ;;  %v1442_v53 = vmul.f32 %v1378_v33, %v1314_v48  ;;  %v1315_v54 = vsel %vm1187_vm10, %v1123_v24, %v1251_v41  ;;  %v1125_v55 = vadd.f32 %v2877_v43, %v1049_v38  ;;  %v1126_v60 = vadd.f32 %v2879_v44, %v1050_v45  ;;  %v1386_v24 = vld [vmem:[%s2659_s8 + $0x188] sm:$0xff]  ;;  %v1060_v36 = vld [vmem:[#allocation2 + $0x1b8] sm:$0xff]  ;;  %v1389_v41 = vld [vmem:[%s2659_s8 + $0x1a0] sm:$0xff] }
 0x2a6   : > { %1504 = vst [vmem:[%s2676_s11 + $0x138] sm:$0xff] %v1440_v46  ;;  %v1443_v57 = vmul.f32 %v1379_v42, %v1315_v54  ;;  %vm1188_vm11 = vcmp.ge.f32.partialorder %v1124_v49, 0.0  ;;  %v1252_v58 = vmul.f32 0.2, %v1124_v49  ;;  %1505 = vst [vmem:[%s2676_s11 + $0x140] sm:$0xff] %v1441_v52  ;;  %v1127_v63 = vadd.f32 %v2877_v43, %v1051_v50  ;;  %v1061_v50 = vld [vmem:[#allocation2 + $0x1c0] sm:$0xff] }
 0x2a7   : > { %1506 = vst [vmem:[%s2676_s11 + $0x148] sm:$0xff] %v1442_v53  ;;  %vm1189_vm12 = vcmp.ge.f32.partialorder %v1125_v55, 0.0  ;;  %v1253_v61 = vmul.f32 0.2, %v1125_v55  ;;  %v1128_v0 = vadd.f32 %v2879_v44, %v1052_v51  ;;  %vm1190_vm13 = vcmp.ge.f32.partialorder %v1126_v60, 0.0  ;;  %v1062_v51 = vld [vmem:[#allocation2 + $0x1c8] sm:$0xff] }
 0x2a8   : > { %1507 = vst [vmem:[%s2676_s11 + $0x150] sm:$0xff] %v1443_v57  ;;  %v1316_v1 = vsel %vm1188_vm11, %v1124_v49, %v1252_v58  ;;  %v1254_v2 = vmul.f32 0.2, %v1126_v60  ;;  %v1129_v4 = vadd.f32 %v2877_v43, %v1053_v56  ;;  %vm1191_vm14 = vcmp.ge.f32.partialorder %v1127_v63, 0.0  ;;  %v1063_v56 = vld [vmem:[#allocation2 + $0x1d0] sm:$0xff]  ;;  %v1064_v57 = vld [vmem:[#allocation2 + $0x1d8] sm:$0xff] }
 0x2a9   : > { %v1444_v5 = vmul.f32 %v1380_v59, %v1316_v1  ;;  %v1317_v6 = vsel %vm1189_vm12, %v1125_v55, %v1253_v61  ;;  %v1255_v7 = vmul.f32 0.2, %v1127_v63  ;;  %vm1192_vm15 = vcmp.ge.f32.partialorder %v1128_v0, 0.0  ;;  %v1390_v55 = vld [vmem:[%s2659_s8 + $0x1a8] sm:$0xff]  ;;  %v1391_v61 = vld [vmem:[%s2659_s8 + $0x1b0] sm:$0xff] }
 0x2aa   : > { %v1445_v11 = vmul.f32 %v1381_v62, %v1317_v6  ;;  %v1318_v12 = vsel %vm1190_vm13, %v1126_v60, %v1254_v2  ;;  %v1256_v13 = vmul.f32 0.2, %v1128_v0  ;;  %vm1193_vm0 = vcmp.ge.f32.partialorder %v1129_v4, 0.0 }
 0x2ab   : > { %1508 = vst [vmem:[%s2676_s11 + $0x158] sm:$0xff] %v1444_v5  ;;  %v1446_v17 = vmul.f32 %v1382_v3, %v1318_v12  ;;  %v1319_v18 = vsel %vm1191_vm14, %v1127_v63, %v1255_v7  ;;  %v1257_v19 = vmul.f32 0.2, %v1129_v4  ;;  %v1130_v23 = vadd.f32 %v2879_v44, %v1054_v9  ;;  %v1392_v63 = vld [vmem:[%s2659_s8 + $0x1b8] sm:$0xff]  ;;  %v1394_v5 = vld [vmem:[%s2659_s8 + $0x1c8] sm:$0xff]  ;;  %v1065_v12 = vld [vmem:[#allocation2 + $0x1e0] sm:$0xff] }
 0x2ac   : > { %1509 = vst [vmem:[%s2676_s11 + $0x160] sm:$0xff] %v1445_v11  ;;  %v1447_v21 = vmul.f32 %v1383_v8, %v1319_v18  ;;  %v1320_v22 = vsel %vm1192_vm15, %v1128_v0, %v1256_v13  ;;  %v1131_v25 = vadd.f32 %v2877_v43, %v1055_v10  ;;  %v1132_v29 = vadd.f32 %v2879_v44, %v1056_v15  ;;  %v1395_v11 = vld [vmem:[%s2659_s8 + $0x1d0] sm:$0xff]  ;;  %v1066_v13 = vld [vmem:[#allocation2 + $0x1e8] sm:$0xff] }
 0x2ad   : > { %1510 = vst [vmem:[%s2676_s11 + $0x168] sm:$0xff] %v1446_v17  ;;  %v1448_v26 = vmul.f32 %v1384_v14, %v1320_v22  ;;  %v1321_v27 = vsel %vm1193_vm0, %v1129_v4, %v1257_v19  ;;  %v1133_v30 = vadd.f32 %v2877_v43, %v1057_v16  ;;  %vm1194_vm1 = vcmp.ge.f32.partialorder %v1130_v23, 0.0  ;;  %v1393_v4 = vld [vmem:[%s2659_s8 + $0x1c0] sm:$0xff]  ;;  %v1396_v17 = vld [vmem:[%s2659_s8 + $0x1d8] sm:$0xff] }
 0x2ae   : > { %1511 = vst [vmem:[%s2676_s11 + $0x170] sm:$0xff] %v1447_v21  ;;  %v1449_v33 = vmul.f32 %v1385_v20, %v1321_v27  ;;  %v1258_v34 = vmul.f32 0.2, %v1130_v23  ;;  %vm1195_vm2 = vcmp.ge.f32.partialorder %v1131_v25, 0.0  ;;  %v1259_v37 = vmul.f32 0.2, %v1131_v25 }
 0x2af   : > { %1512 = vst [vmem:[%s2676_s11 + $0x178] sm:$0xff] %v1448_v26  ;;  %vm1196_vm3 = vcmp.ge.f32.partialorder %v1132_v29, 0.0  ;;  %v1260_v38 = vmul.f32 0.2, %v1132_v29  ;;  %vm1197_vm4 = vcmp.ge.f32.partialorder %v1133_v30, 0.0  ;;  %v1134_v42 = vadd.f32 %v2879_v44, %v1058_v31 }
 0x2b0   : > { %1513 = vst [vmem:[%s2676_s11 + $0x180] sm:$0xff] %v1449_v33  ;;  %v1322_v39 = vsel %vm1194_vm1, %v1130_v23, %v1258_v34  ;;  %v1261_v40 = vmul.f32 0.2, %v1133_v30  ;;  %v1135_v45 = vadd.f32 %v2877_v43, %v1059_v32  ;;  %v1323_v47 = vsel %vm1195_vm2, %v1131_v25, %v1259_v37  ;;  %v1068_v25 = vld [vmem:[#allocation2 + $0x1f8] sm:$0xff]  ;;  %v1397_v33 = vld [vmem:[%s2659_s8 + $0x1e0] sm:$0xff] }
 0x2b1   : > { %v1450_v46 = vmul.f32 %v1386_v24, %v1322_v39  ;;  %v1324_v48 = vsel %vm1196_vm3, %v1132_v29, %v1260_v38  ;;  %v1136_v49 = vadd.f32 %v2879_v44, %v1060_v36  ;;  %v1451_v52 = vmul.f32 %v1387_v28, %v1323_v47  ;;  %v1067_v24 = vld [vmem:[#allocation2 + $0x1f0] sm:$0xff]  ;;  %v1400_v47 = vld [vmem:[%s2659_s8 + $0x1f8] sm:$0xff] }
 0x2b2   : > { %v1452_v53 = vmul.f32 %v1388_v35, %v1324_v48  ;;  %v1325_v54 = vsel %vm1197_vm4, %v1133_v30, %v1261_v40  ;;  %vm1198_vm5 = vcmp.ge.f32.partialorder %v1134_v42, 0.0  ;;  %v1262_v59 = vmul.f32 0.2, %v1134_v42  ;;  %v1398_v35 = vld [vmem:[%s2659_s8 + $0x1e8] sm:$0xff] }
 0x2b3   : > { %1514 = vst [vmem:[%s2676_s11 + $0x188] sm:$0xff] %v1450_v46  ;;  %v1453_v58 = vmul.f32 %v1389_v41, %v1325_v54  ;;  %vm1199_vm6 = vcmp.ge.f32.partialorder %v1135_v45, 0.0  ;;  %v1263_v60 = vmul.f32 0.2, %v1135_v45  ;;  %1515 = vst [vmem:[%s2676_s11 + $0x190] sm:$0xff] %v1451_v52  ;;  %vm1200_vm7 = vcmp.ge.f32.partialorder %v1136_v49, 0.0 }
 0x2b4   : > { %1516 = vst [vmem:[%s2676_s11 + $0x198] sm:$0xff] %v1452_v53  ;;  %v1264_v62 = vmul.f32 0.2, %v1136_v49  ;;  %v1137_v0 = vadd.f32 %v2877_v43, %v1061_v50  ;;  %v1138_v1 = vadd.f32 %v2879_v44, %v1062_v51  ;;  %v1326_v2 = vsel %vm1198_vm5, %v1134_v42, %v1262_v59  ;;  %v1399_v42 = vld [vmem:[%s2659_s8 + $0x1f0] sm:$0xff] }
 0x2b5   : > { %1517 = vst [vmem:[%s2676_s11 + $0x1a0] sm:$0xff] %v1453_v58  ;;  %v1327_v3 = vsel %vm1199_vm6, %v1135_v45, %v1263_v60  ;;  %v1139_v6 = vadd.f32 %v2877_v43, %v1063_v56  ;;  %v1140_v7 = vadd.f32 %v2879_v44, %v1064_v57  ;;  %v1454_v8 = vmul.f32 %v1390_v55, %v1326_v2 }
 0x2b6   : > { %v1455_v9 = vmul.f32 %v1391_v61, %v1327_v3  ;;  %v1328_v10 = vsel %vm1200_vm7, %v1136_v49, %v1264_v62  ;;  %vm1201_vm8 = vcmp.ge.f32.partialorder %v1137_v0, 0.0  ;;  %v1265_v15 = vmul.f32 0.2, %v1137_v0 }
 0x2b7   : > { %v1456_v14 = vmul.f32 %v1392_v63, %v1328_v10  ;;  %vm1202_vm9 = vcmp.ge.f32.partialorder %v1138_v1, 0.0  ;;  %v1266_v16 = vmul.f32 0.2, %v1138_v1  ;;  %1518 = vst [vmem:[%s2676_s11 + $0x1a8] sm:$0xff] %v1454_v8  ;;  %vm1203_vm10 = vcmp.ge.f32.partialorder %v1139_v6, 0.0 }
 0x2b8   : > { %1519 = vst [vmem:[%s2676_s11 + $0x1b0] sm:$0xff] %v1455_v9  ;;  %v1267_v18 = vmul.f32 0.2, %v1139_v6  ;;  %vm1204_vm11 = vcmp.ge.f32.partialorder %v1140_v7, 0.0  ;;  %v1268_v19 = vmul.f32 0.2, %v1140_v7  ;;  %v1329_v20 = vsel %vm1201_vm8, %v1137_v0, %v1265_v15 }
 0x2b9   : > { %1520 = vst [vmem:[%s2676_s11 + $0x1b8] sm:$0xff] %v1456_v14  ;;  %v1330_v21 = vsel %vm1202_vm9, %v1138_v1, %v1266_v16  ;;  %v1141_v22 = vadd.f32 %v2877_v43, %v1065_v12  ;;  %v1142_v23 = vadd.f32 %v2879_v44, %v1066_v13  ;;  %v1457_v26 = vmul.f32 %v1393_v4, %v1329_v20 }
 0x2ba   : > { %v1458_v27 = vmul.f32 %v1394_v5, %v1330_v21  ;;  %v1331_v28 = vsel %vm1203_vm10, %v1139_v6, %v1267_v18  ;;  %v1332_v29 = vsel %vm1204_vm11, %v1140_v7, %v1268_v19  ;;  %v1143_v36 = vadd.f32 %v2877_v43, %v1067_v24 }
 0x2bb   : > { %v1459_v30 = vmul.f32 %v1395_v11, %v1331_v28  ;;  %v1460_v31 = vmul.f32 %v1396_v17, %v1332_v29  ;;  %vm1205_vm12 = vcmp.ge.f32.partialorder %v1141_v22, 0.0  ;;  %v1269_v32 = vmul.f32 0.2, %v1141_v22  ;;  %1521 = vst [vmem:[%s2676_s11 + $0x1c0] sm:$0xff] %v1457_v26 }
 0x2bc   : > { %1522 = vst [vmem:[%s2676_s11 + $0x1c8] sm:$0xff] %v1458_v27  ;;  %vm1206_vm13 = vcmp.ge.f32.partialorder %v1142_v23, 0.0  ;;  %v1270_v34 = vmul.f32 0.2, %v1142_v23  ;;  %v1144_v37 = vadd.f32 %v2879_v44, %v1068_v25  ;;  %vm1207_vm14 = vcmp.ge.f32.partialorder %v1143_v36, 0.0 }
 0x2bd   : > { %1523 = vst [vmem:[%s2676_s11 + $0x1d0] sm:$0xff] %v1459_v30  ;;  %1524 = vst [vmem:[%s2676_s11 + $0x1d8] sm:$0xff] %v1460_v31  ;;  %v1333_v38 = vsel %vm1205_vm12, %v1141_v22, %v1269_v32  ;;  %v1271_v41 = vmul.f32 0.2, %v1143_v36 }
 0x2be   : > { %v1461_v39 = vmul.f32 %v1397_v33, %v1333_v38  ;;  %v1334_v40 = vsel %vm1206_vm13, %v1142_v23, %v1270_v34  ;;  %vm1208_vm15 = vcmp.ge.f32.partialorder %v1144_v37, 0.0  ;;  %v1272_v46 = vmul.f32 0.2, %v1144_v37 }
 0x2bf   : > { %v1462_v45 = vmul.f32 %v1398_v35, %v1334_v40  ;;  %v1335_v48 = vsel %vm1207_vm14, %v1143_v36, %v1271_v41 }
 0x2c0   : > { %1525 = vst [vmem:[%s2676_s11 + $0x1e0] sm:$0xff] %v1461_v39  ;;  %v1463_v43 = vmul.f32 %v1399_v42, %v1335_v48  ;;  %v1336_v49 = vsel %vm1208_vm15, %v1144_v37, %v1272_v46 }
 0x2c1   : > { %1526 = vst [vmem:[%s2676_s11 + $0x1e8] sm:$0xff] %v1462_v45  ;;  %v1464_v44 = vmul.f32 %v1400_v47, %v1336_v49 }
 0x2c2   : > { %1527 = vst [vmem:[%s2676_s11 + $0x1f0] sm:$0xff] %v1463_v43 }
 0x2c3   : > { %1528 = vst [vmem:[%s2676_s11 + $0x1f8] sm:$0xff] %v1464_v44 }
 0x2c4 PF: > { %s3264_s2 = sld [smem:[#allocation19_spill]]  ;;  %s1546_s16 = sshll.u32 %s2676_s11, 4  ;;  %s3084_s16 = int_to_ptr.vmem [resolvable:$true] %s1546_s16 }
 0x2c5   : > { %s3266_s28 = sld [smem:[#allocation31_spill]]  ;;  %s3093_s21 = scalar_lea.sflag [#allocation5], %s302_s4 }
 0x2c6   : > { %s2083_s25 = scalar_lea.vmem %s3084_s16, 8192  ;;  %p3268_p3 = scmp.ne.s32.totalorder %s3247_s24, 0 }
 0x2c7   : > { %p2084_p0 = scmp.ne.s32.totalorder %s3084_s16, %s2083_s25 }
 0x2c9   : > { %p2085_p13 = pnand %p2084_p0, %p3268_p3 }
 0x2ca   : > { %s1737_s7 = sshll.u32 %s3264_s2, 7 }
 0x2cb   : > { %s1543_s1 = sadd.s32 %s1737_s7, %s2666_s26  ;;  %s3267_s6 = smov %s3266_s28 }
 0x2cc   : > { %s1731_s5 = sshll.u32 %s1543_s1, 7  ;;  %p2086_p7 = pneg %p2085_p13 }
 0x2cd   : > { %s3089_s29 = scalar_lea.hbm %s3266_s28, %s1731_s5  ;;  %s2262_s26 = smov [#allocation9]  }
 0x2ce   : > { %s2087_s11 = sshll.u32 %s2262_s26, 4  ;;  %s2088_s11 = int_to_ptr.vmem [resolvable:$false] %s2087_s11 }
 0x2cf   : > { %s2089_s15 = scalar_lea.vmem %s2088_s11, 16384  ;;  %p2090_p11 = scmp.lt.s32.totalorder %s3084_s16, %s2088_s11 }
 0x2d0   : > { %p2091_p6 = scmp.lt.s32.totalorder %s2089_s15, %s2083_s25 }
 0x2d2   : > { %p2092_p9 = por %p2091_p6, %p2090_p11 }
 0x2d4   : > { %p2093_p1 = pnand %p2092_p9, %p2086_p7 }
 0x2d6   : > { %2096 = shalt.err (!%p2093_p1)
}
 0x2d7   : > { %s2097_s4 = scalar_lea.hbm %s3089_s29, 8192  ;;  %s2101_s0 = scalar_lea.hbm %s3267_s6, 32768 }
 0x2d8   : > { %p2098_p12 = scmp.ne.s32.totalorder %s3089_s29, %s2097_s4  ;;  %p2102_p2 = scmp.lt.u32.totalorder %s3089_s29, %s3267_s6 }
 0x2d9   : > { %p2103_p4 = scmp.lt.u32.totalorder %s2101_s0, %s2097_s4  ;;  %p2105_p0 = scmp.lt.u32.totalorder %s2097_s4, %s3089_s29 }
 0x2da   : > { %p2099_p8 = pnand %p2098_p12, %p3268_p3 }
 0x2db   : > { %p2104_p10 = por %p2103_p4, %p2102_p2 }
 0x2dc   : > { %p2100_p5 = pneg %p2099_p8 }
 0x2dd   : > { %p2106_p13 = por %p2105_p0, %p2104_p10 }
 0x2df   : > { %p2107_p7 = pnand %p2106_p13, %p2100_p5 }
 0x2e1   : > { %2110 = shalt.err (!%p2107_p7)
}
 0x2e2   : > { %s2263_s7 = smov 256   ;;  %s2264_s1 = smov 512  }
 0x2e3   : > { %s2265_s5 = smov 16  }
 0x2e4   : > { %1840 = dma.vmem_to_hbm [thread:$0]  (%p3268_p3), %s3084_s16, 8192, %s3089_s29, %s3093_s21, %s2263_s7, %s2264_s1, %s2265_s5  }
 0x2e5 PF: > { %s3269_s8 = sld [smem:[#allocation14_spill]]  ;;  %p1857_p11 = scmp.ge.s32.totalorder %s2253_s30, 2 }
 0x2e6   : > { %p3270_p6 = scmp.ne.s32.totalorder %s3248_s13, 0 }
 0x2e8   : > { %p1853_p9 = pnand %p1857_p11, %p3270_p6 }
 0x2eb   : > { %s1561_s12 = sand.u32 1, %s3269_s8  }
 0x2ec   : > { %s1562_s28 = scalar_lea.sflag [#allocation5], %s1561_s12 }
 0x2ed   : > { %2188 = dma.done.wait (!%p1853_p9), %s1562_s28, 8192  }
 0x2ee   : > { %2190 = vsyncadd (!%p1853_p9), %s1562_s28, 4294959104  ;;  %s23_s30 = sadd.s32 1, %s2253_s30   ;;  %s3272_s15 = sld [smem:[#allocation15_spill]] }
 0x2ef   : > { %p3122_p1 = scmp.ge.s32.totalorder %s23_s30, 10   ;;  %s3273_s24 = sld [smem:[#allocation16_spill]] }
 0x2f0   : > { %s3274_s29 = sld [smem:[#allocation25_spill]]  ;;  %s3275_s13 = sld [smem:[#allocation20_spill]] }
 0x2f1   : > { %s3276_s26 = sld [smem:[#allocation21_spill]]  ;;  %s3277_s11 = sld [smem:[#allocation22_spill]] }
 0x2f2   : > { %s3278_s28 = sld [smem:[#allocation23_spill]]  ;;  %s3279_s4 = sld [smem:[#allocation26_spill]] }
 0x2f3   : > { %s3281_s16 = smov %s2201_s17  ;;  %s3282_s17 = smov %s2573_s18 }
 0x2f4   : > { %s3284_s19 = smov %s2213_s20  ;;  %s3286_s21 = smov %s2221_s22 }
 0x2f5   : > { %s3283_s18 = smov %s3273_s24  ;;  %s3287_s22 = smov %s2225_s23 }
 0x2f6   : > { %s3285_s20 = smov %s3274_s29  ;;  %s3288_s23 = smov %s2513_s3 }
 0x2f7   : > { %s3289_s24 = smov %s2241_s27  ;;  %s3290_s25 = smov %s3275_s13 }
 0x2f8   : > { %s3291_s27 = smov %s3277_s11  ;;  %s3292_s29 = smov %s3279_s4 }
 0x2f9   :  { %22 = sbr.rel (!%p3122_p1) target bundleno = 19 (0x13), region = 116 }
 0x300   :  { %1567 = vsyncpa [#allocation4], 1 }
 0x301   :  { %1569 = vsyncpa [#allocation4 + $0x1], 1 }
 0x302   :  { %1570 = vsyncpa [#allocation7], 1 }
 0x303   :  { %1572 = vsyncpa [#allocation7 + $0x1], 1 }
 0x304   :  { %1573 = vsyncpa [#allocation5], 1 }
 0x305   :  { %1575 = vsyncpa [#allocation5 + $0x1], 1 }

</bundles_post_ra>
